<compile_context>
chip_gen: v5e
topology: v5e:2x2
jax: 0.10.0
libtpu: 0.0.40
codegen_flags: <defaults>
</compile_context>

<pallas_src>
import functools

import jax
import jax.numpy as jnp
from jax import lax
from jax.experimental import pallas as pl
from jax.experimental.pallas import tpu as pltpu


def mlp_kernel(x_ref, w1_ref, b1_ref, wdw_ref, bdw_ref, w2_ref, b2_ref, o_ref, *, H, W):
    HW = H * W

    # ---- fc1: 1x1 conv + folded BN (MXU, f32 accumulation) ----
    x = x_ref[0]                                                     # (BP*Cin, HW)
    y1 = jnp.dot(w1_ref[...], x,
                 preferred_element_type=jnp.float32) + b1_ref[...]   # (BP*Chid, HW)

    # ---- boundary masks (hoisted; one lane-iota, no integer division) ----
    pos = lax.broadcasted_iota(jnp.int32, (1, HW), 1)
    col = pos % W
    not_left = col > 0
    not_right = col < (W - 1)
    not_top = pos >= W
    not_bot = pos < (HW - W)

    # ---- depthwise 3x3 conv (pad=1), separable shift accumulation ----
    # tap column t = (di+1)*3 + (dj+1); rolls are linear w.r.t. per-channel weights.
    wdw = wdw_ref[...]                                               # (BP*Chid, 9)

    # stage 1: the three horizontal (dj) taps, built once (2 rolls + 2 selects)
    hc_l = jnp.where(not_left, pltpu.roll(y1, 1, axis=1), 0.0)        # y1[p-1]
    hc_c = y1                                                         # y1[p]
    hc_r = jnp.where(not_right, pltpu.roll(y1, HW - 1, axis=1), 0.0)  # y1[p+1]

    # stage 2: weight-combine per row offset, then ONE vertical roll + mask per di
    def row_combine(r):  # r = di + 1
        return (hc_l * wdw[:, 3 * r + 0:3 * r + 1]
                + hc_c * wdw[:, 3 * r + 1:3 * r + 2]
                + hc_r * wdw[:, 3 * r + 2:3 * r + 3])

    p_top = row_combine(0)   # di = -1 (row above)
    p_mid = row_combine(1)   # di =  0
    p_bot = row_combine(2)   # di = +1 (row below)

    acc = p_mid + bdw_ref[...]
    acc = acc + jnp.where(not_top, pltpu.roll(p_top, W, axis=1), 0.0)
    acc = acc + jnp.where(not_bot, pltpu.roll(p_bot, HW - W, axis=1), 0.0)

    # ---- ReLU (dropout p=0.0 is identity) ----
    a = jnp.maximum(acc, 0.0)

    # ---- fc2: 1x1 conv + folded BN (MXU, f32 accumulation) ----
    o_ref[0] = jnp.dot(w2_ref[...], a,
                       preferred_element_type=jnp.float32) + b2_ref[...]   # (BP*Cout, HW)


def _block_diag(w, bp):
    """(Co, Ci) -> (bp*Co, bp*Ci) block-diagonal (per-image matmul after batch packing)."""
    if bp == 1:
        return w
    Co, Ci = w.shape
    out = jnp.zeros((bp, Co, bp, Ci), w.dtype)
    idx = jnp.arange(bp)
    out = out.at[idx, :, idx, :].set(w)
    return out.reshape(bp * Co, bp * Ci)


def _pick_vmem_limit_bytes():
    """Generation-dependent VMEM budget: ~3/4 of physical, capped below 100 MiB."""
    try:
        cap = pltpu.get_tpu_info().vmem_capacity_bytes
    except Exception:
        cap = 64 * 1024 * 1024          # conservative fallback, safe on every generation
    return int(min(cap * 3 // 4, 100 * 1024 * 1024))


def mlp_pallas(x_nchw, w1t, b1, wdw, bdw, w2t, b2):
    """x_nchw: (N, Cin, H, W) f32.
    w1t: (Chid, Cin), b1: (Chid, 1)   -- fc1 conv+BN folded
    wdw: (Chid, 3, 3), bdw: (Chid, 1) -- depthwise conv
    w2t: (Cout, Chid), b2: (Cout, 1)  -- fc2 conv+BN folded
    Returns (N, Cout, H, W)."""
    N, Cin, H, W = x_nchw.shape
    Chid = w1t.shape[0]
    Cout = w2t.shape[0]
    HW = H * W

    # Batch packing factor: fold BP images onto the channel axis so the (Cin/Cout, HW)
    # I/O tiles fill all 8 sublanes.  BP must divide N.
    target = max(1, -(-8 // max(min(Cin, Cout), 1)))   # ceil(8 / min(Cin, Cout))
    BP = 1
    for cand in range(1, min(N, target) + 1):
        if N % cand == 0:
            BP = cand

    x_packed = x_nchw.reshape(N // BP, BP * Cin, HW)     # pure view, no transpose
    w1p = _block_diag(w1t, BP)                           # (BP*Chid, BP*Cin)
    b1p = jnp.tile(b1, (BP, 1))                          # (BP*Chid, 1)
    wdwp = jnp.tile(wdw.reshape(Chid, 9), (BP, 1))       # (BP*Chid, 9)
    bdwp = jnp.tile(bdw, (BP, 1))                        # (BP*Chid, 1)
    w2p = _block_diag(w2t, BP)                           # (BP*Cout, BP*Chid)
    b2p = jnp.tile(b2, (BP, 1))                          # (BP*Cout, 1)

    kernel = functools.partial(mlp_kernel, H=H, W=W)

    out_packed = pl.pallas_call(
        kernel,
        out_shape=jax.ShapeDtypeStruct((N // BP, BP * Cout, HW), jnp.float32),
        grid_spec=pltpu.PrefetchScalarGridSpec(
            num_scalar_prefetch=0,
            grid=(N // BP,),
            in_specs=[
                pl.BlockSpec((1, BP * Cin, HW), lambda b: (b, 0, 0)),
                pl.BlockSpec((BP * Chid, BP * Cin), lambda b: (0, 0)),
                pl.BlockSpec((BP * Chid, 1), lambda b: (0, 0)),
                pl.BlockSpec((BP * Chid, 9), lambda b: (0, 0)),
                pl.BlockSpec((BP * Chid, 1), lambda b: (0, 0)),
                pl.BlockSpec((BP * Cout, BP * Chid), lambda b: (0, 0)),
                pl.BlockSpec((BP * Cout, 1), lambda b: (0, 0)),
            ],
            out_specs=pl.BlockSpec((1, BP * Cout, HW), lambda b: (b, 0, 0)),
        ),
        compiler_params=pltpu.CompilerParams(
            dimension_semantics=("parallel",),
            vmem_limit_bytes=_pick_vmem_limit_bytes(),
        ),
    )(x_packed, w1p, b1p, wdwp, bdwp, w2p, b2p)

    return out_packed.reshape(N, Cout, H, W)             # pure view, no transpose


def fold_conv_bn(conv_w, gamma, beta, mean, var, eps=1e-5):
    """Fold BatchNorm2d (eval) into a 1x1 conv.

    conv_w: (Cout, Cin).  Returns weight (Cout, Cin) and bias (Cout, 1) for the
    channels-leading (C, H*W) kernel layout."""
    scale = gamma / jnp.sqrt(var + eps)                  # (Cout,)
    w_eff = conv_w * scale[:, None]                      # (Cout, Cin)
    b_eff = (beta - mean * scale)[:, None]               # (Cout, 1)
    return w_eff.astype(jnp.float32), b_eff.astype(jnp.float32)


def reference_mlp(x_nchw, w1t, b1, wdw, bdw, w2t, b2):
    """Pure-JAX reference (NCHW), used to sanity-check the kernel."""
    Chid = w1t.shape[0]
    Cout = w2t.shape[0]
    y1 = jnp.einsum('nchw,dc->ndhw', x_nchw, w1t) + b1.reshape(1, Chid, 1, 1)
    y1 = lax.conv_general_dilated(
        y1, wdw[:, None, :, :], window_strides=(1, 1), padding='SAME',
        feature_group_count=Chid,
        dimension_numbers=('NCHW', 'OIHW', 'NCHW')) + bdw.reshape(1, Chid, 1, 1)
    y1 = jnp.maximum(y1, 0.0)
    y2 = jnp.einsum('nchw,dc->ndhw', y1, w2t) + b2.reshape(1, Cout, 1, 1)
    return y2


if __name__ == "__main__":
    key = jax.random.PRNGKey(0)
    N, Cin, H, W = 2, 4, 16, 16
    Chid = 32            # hidden_features
    Cout = Cin           # out_features defaults to in_features

    ks = jax.random.split(key, 12)
    x = jax.random.normal(ks[0], (N, Cin, H, W), jnp.float32)

    # fc1 = Conv2d(Cin, Chid, 1, bias=False) + BN(Chid)
    conv1_w = jax.random.normal(ks[1], (Chid, Cin), jnp.float32) * 0.1
    g1 = jax.random.uniform(ks[2], (Chid,), jnp.float32, 0.5, 1.5)
    bt1 = jax.random.normal(ks[3], (Chid,), jnp.float32) * 0.1
    mu1 = jax.random.normal(ks[4], (Chid,), jnp.float32) * 0.1
    v1 = jax.random.uniform(ks[5], (Chid,), jnp.float32, 0.5, 1.5)
    w1t, b1 = fold_conv_bn(conv1_w, g1, bt1, mu1, v1)

    # dwconv = Conv2d(Chid, Chid, 3, 1, 1, groups=Chid, bias=True)
    wdw = jax.random.normal(ks[6], (Chid, 3, 3), jnp.float32) * 0.1
    bdw = (jax.random.normal(ks[7], (Chid,), jnp.float32) * 0.1)[:, None]

    # fc2 = Conv2d(Chid, Cout, 1, bias=False) + BN(Cout)
    conv2_w = jax.random.normal(ks[8], (Cout, Chid), jnp.float32) * 0.1
    g2 = jax.random.uniform(ks[9], (Cout,), jnp.float32, 0.5, 1.5)
    bt2 = jax.random.normal(ks[10], (Cout,), jnp.float32) * 0.1
    mu2 = jnp.zeros((Cout,), jnp.float32)
    v2 = jax.random.uniform(ks[11], (Cout,), jnp.float32, 0.5, 1.5)
    w2t, b2 = fold_conv_bn(conv2_w, g2, bt2, mu2, v2)

    out = jax.block_until_ready(mlp_pallas(x, w1t, b1, wdw, bdw, w2t, b2))
    ref = jax.block_until_ready(reference_mlp(x, w1t, b1, wdw, bdw, w2t, b2))

    assert out.shape == (N, Cout, H, W)
    assert jnp.allclose(out, ref, atol=1e-4, rtol=1e-4), "mismatch vs reference"

    print("KERNEL_OK")
</pallas_src>

<mosaic_0001>
module attributes {stable_mosaic.version = 11 : i64} {
  func.func @mlp_kernel(%arg0: i32, %arg1: memref<1x8x256xf32, #tpu.memory_space<vmem>>, %arg2: memref<64x8xf32, #tpu.memory_space<vmem>>, %arg3: memref<64x1xf32, #tpu.memory_space<vmem>>, %arg4: memref<64x9xf32, #tpu.memory_space<vmem>>, %arg5: memref<64x1xf32, #tpu.memory_space<vmem>>, %arg6: memref<8x64xf32, #tpu.memory_space<vmem>>, %arg7: memref<8x1xf32, #tpu.memory_space<vmem>>, %arg8: memref<1x8x256xf32, #tpu.memory_space<vmem>>) attributes {dimension_semantics = [#tpu.dimension_semantics<parallel>], iteration_bounds = array<i64: 1>, scalar_prefetch = 0 : i64, scratch_operands = 0 : i64, tpu.core_type = #tpu.core_type<tc>, window_params = [{transform_indices = @transform_0, window_bounds = array<i64: 1, 8, 256>}, {pipeline_mode = #tpu.pipeline_mode<synchronous>, transform_indices = @transform_1, window_bounds = array<i64: 64, 8>}, {pipeline_mode = #tpu.pipeline_mode<synchronous>, transform_indices = @transform_2, window_bounds = array<i64: 64, 1>}, {pipeline_mode = #tpu.pipeline_mode<synchronous>, transform_indices = @transform_3, window_bounds = array<i64: 64, 9>}, {pipeline_mode = #tpu.pipeline_mode<synchronous>, transform_indices = @transform_4, window_bounds = array<i64: 64, 1>}, {pipeline_mode = #tpu.pipeline_mode<synchronous>, transform_indices = @transform_5, window_bounds = array<i64: 8, 64>}, {pipeline_mode = #tpu.pipeline_mode<synchronous>, transform_indices = @transform_6, window_bounds = array<i64: 8, 1>}, {transform_indices = @transform_7, window_bounds = array<i64: 1, 8, 256>}]} {
    %c0 = arith.constant 0 : index
    %c0_0 = arith.constant 0 : index
    %c0_1 = arith.constant 0 : index
    %0 = vector.load %arg1[%c0, %c0_0, %c0_1] : memref<1x8x256xf32, #tpu.memory_space<vmem>>, vector<1x8x256xf32>
    %1 = vector.shape_cast %0 : vector<1x8x256xf32> to vector<8x256xf32>
    %c0_2 = arith.constant 0 : index
    %c0_3 = arith.constant 0 : index
    %2 = vector.load %arg2[%c0_2, %c0_3] : memref<64x8xf32, #tpu.memory_space<vmem>>, vector<64x8xf32>
    %cst = arith.constant dense<0.000000e+00> : vector<64x256xf32>
    %3 = tpu.matmul %2, %1, %cst {dimension_numbers = #tpu.dot_dimension_numbers<[1], [0], [0], [1], [0, 0, 1, 1], [], []>} : vector<64x8xf32>, vector<8x256xf32>, vector<64x256xf32> -> vector<64x256xf32>
    %c0_4 = arith.constant 0 : index
    %c0_5 = arith.constant 0 : index
    %4 = vector.load %arg3[%c0_4, %c0_5] : memref<64x1xf32, #tpu.memory_space<vmem>>, vector<64x1xf32>
    %5 = vector.broadcast %4 : vector<64x1xf32> to vector<64x256xf32>
    %6 = arith.addf %3, %5 : vector<64x256xf32>
    %7 = tpu.iota {dimensions = array<i32: 1>} : vector<1x256xi32>
    %c16_i32 = arith.constant 16 : i32
    %c0_i32 = arith.constant 0 : i32
    %8 = arith.cmpi eq, %c16_i32, %c0_i32 : i32
    %c1_i32 = arith.constant 1 : i32
    %9 = arith.select %8, %c1_i32, %c16_i32 : i32
    %10 = vector.broadcast %9 : i32 to vector<1x256xi32>
    %11 = arith.remsi %7, %10 : vector<1x256xi32>
    %c0_i32_6 = arith.constant 0 : i32
    %12 = vector.broadcast %c0_i32_6 : i32 to vector<1x256xi32>
    %13 = arith.cmpi ne, %11, %12 : vector<1x256xi32>
    %c0_i32_7 = arith.constant 0 : i32
    %14 = vector.broadcast %c0_i32_7 : i32 to vector<1x256xi32>
    %15 = arith.cmpi slt, %11, %14 : vector<1x256xi32>
    %c0_i32_8 = arith.constant 0 : i32
    %16 = arith.cmpi slt, %9, %c0_i32_8 : i32
    %17 = vector.broadcast %16 : i1 to vector<1x256xi1>
    %18 = vector.broadcast %17 : vector<1x256xi1> to vector<1x256xi1>
    %19 = arith.xori %15, %18 : vector<1x256xi1>
    %20 = arith.andi %19, %13 : vector<1x256xi1>
    %21 = vector.broadcast %9 : i32 to vector<1x256xi32>
    %22 = arith.addi %11, %21 : vector<1x256xi32>
    %23 = arith.select %20, %22, %11 : vector<1x256xi1>, vector<1x256xi32>
    %c0_i32_9 = arith.constant 0 : i32
    %24 = vector.broadcast %c0_i32_9 : i32 to vector<1x256xi32>
    %25 = arith.cmpi sgt, %23, %24 : vector<1x256xi32>
    %c15_i32 = arith.constant 15 : i32
    %26 = vector.broadcast %c15_i32 : i32 to vector<1x256xi32>
    %27 = arith.cmpi slt, %23, %26 : vector<1x256xi32>
    %c16_i32_10 = arith.constant 16 : i32
    %28 = vector.broadcast %c16_i32_10 : i32 to vector<1x256xi32>
    %29 = arith.cmpi sge, %7, %28 : vector<1x256xi32>
    %c240_i32 = arith.constant 240 : i32
    %30 = vector.broadcast %c240_i32 : i32 to vector<1x256xi32>
    %31 = arith.cmpi slt, %7, %30 : vector<1x256xi32>
    %c0_11 = arith.constant 0 : index
    %c0_12 = arith.constant 0 : index
    %32 = vector.load %arg4[%c0_11, %c0_12] : memref<64x9xf32, #tpu.memory_space<vmem>>, vector<64x9xf32>
    %c1_i32_13 = arith.constant 1 : i32
    %33 = tpu.dynamic_rotate %6 by %c1_i32_13 dim 1 : vector<64x256xf32>, i32 -> vector<64x256xf32>
    %cst_14 = arith.constant 0.000000e+00 : f32
    %34 = vector.shape_cast %25 : vector<1x256xi1> to vector<1x256xi1>
    %35 = vector.broadcast %34 : vector<1x256xi1> to vector<64x256xi1>
    %36 = vector.broadcast %cst_14 : f32 to vector<64x256xf32>
    %37 = arith.select %35, %33, %36 : vector<64x256xi1>, vector<64x256xf32>
    %c255_i32 = arith.constant 255 : i32
    %38 = tpu.dynamic_rotate %6 by %c255_i32 dim 1 : vector<64x256xf32>, i32 -> vector<64x256xf32>
    %cst_15 = arith.constant 0.000000e+00 : f32
    %39 = vector.shape_cast %27 : vector<1x256xi1> to vector<1x256xi1>
    %40 = vector.broadcast %39 : vector<1x256xi1> to vector<64x256xi1>
    %41 = vector.broadcast %cst_15 : f32 to vector<64x256xf32>
    %42 = arith.select %40, %38, %41 : vector<64x256xi1>, vector<64x256xf32>
    %43 = vector.extract_strided_slice %32 {offsets = [0, 0], sizes = [64, 1], strides = [1, 1]} : vector<64x9xf32> to vector<64x1xf32>
    %44 = vector.broadcast %43 : vector<64x1xf32> to vector<64x256xf32>
    %45 = arith.mulf %37, %44 : vector<64x256xf32>
    %46 = vector.extract_strided_slice %32 {offsets = [0, 1], sizes = [64, 1], strides = [1, 1]} : vector<64x9xf32> to vector<64x1xf32>
    %47 = vector.broadcast %46 : vector<64x1xf32> to vector<64x256xf32>
    %48 = arith.mulf %6, %47 : vector<64x256xf32>
    %49 = arith.addf %45, %48 : vector<64x256xf32>
    %50 = vector.extract_strided_slice %32 {offsets = [0, 2], sizes = [64, 1], strides = [1, 1]} : vector<64x9xf32> to vector<64x1xf32>
    %51 = vector.broadcast %50 : vector<64x1xf32> to vector<64x256xf32>
    %52 = arith.mulf %42, %51 : vector<64x256xf32>
    %53 = arith.addf %49, %52 : vector<64x256xf32>
    %54 = vector.extract_strided_slice %32 {offsets = [0, 3], sizes = [64, 1], strides = [1, 1]} : vector<64x9xf32> to vector<64x1xf32>
    %55 = vector.broadcast %54 : vector<64x1xf32> to vector<64x256xf32>
    %56 = arith.mulf %37, %55 : vector<64x256xf32>
    %57 = vector.extract_strided_slice %32 {offsets = [0, 4], sizes = [64, 1], strides = [1, 1]} : vector<64x9xf32> to vector<64x1xf32>
    %58 = vector.broadcast %57 : vector<64x1xf32> to vector<64x256xf32>
    %59 = arith.mulf %6, %58 : vector<64x256xf32>
    %60 = arith.addf %56, %59 : vector<64x256xf32>
    %61 = vector.extract_strided_slice %32 {offsets = [0, 5], sizes = [64, 1], strides = [1, 1]} : vector<64x9xf32> to vector<64x1xf32>
    %62 = vector.broadcast %61 : vector<64x1xf32> to vector<64x256xf32>
    %63 = arith.mulf %42, %62 : vector<64x256xf32>
    %64 = arith.addf %60, %63 : vector<64x256xf32>
    %65 = vector.extract_strided_slice %32 {offsets = [0, 6], sizes = [64, 1], strides = [1, 1]} : vector<64x9xf32> to vector<64x1xf32>
    %66 = vector.broadcast %65 : vector<64x1xf32> to vector<64x256xf32>
    %67 = arith.mulf %37, %66 : vector<64x256xf32>
    %68 = vector.extract_strided_slice %32 {offsets = [0, 7], sizes = [64, 1], strides = [1, 1]} : vector<64x9xf32> to vector<64x1xf32>
    %69 = vector.broadcast %68 : vector<64x1xf32> to vector<64x256xf32>
    %70 = arith.mulf %6, %69 : vector<64x256xf32>
    %71 = arith.addf %67, %70 : vector<64x256xf32>
    %72 = vector.extract_strided_slice %32 {offsets = [0, 8], sizes = [64, 1], strides = [1, 1]} : vector<64x9xf32> to vector<64x1xf32>
    %73 = vector.broadcast %72 : vector<64x1xf32> to vector<64x256xf32>
    %74 = arith.mulf %42, %73 : vector<64x256xf32>
    %75 = arith.addf %71, %74 : vector<64x256xf32>
    %c0_16 = arith.constant 0 : index
    %c0_17 = arith.constant 0 : index
    %76 = vector.load %arg5[%c0_16, %c0_17] : memref<64x1xf32, #tpu.memory_space<vmem>>, vector<64x1xf32>
    %77 = vector.broadcast %76 : vector<64x1xf32> to vector<64x256xf32>
    %78 = arith.addf %64, %77 : vector<64x256xf32>
    %c16_i32_18 = arith.constant 16 : i32
    %79 = tpu.dynamic_rotate %53 by %c16_i32_18 dim 1 : vector<64x256xf32>, i32 -> vector<64x256xf32>
    %cst_19 = arith.constant 0.000000e+00 : f32
    %80 = vector.shape_cast %29 : vector<1x256xi1> to vector<1x256xi1>
    %81 = vector.broadcast %80 : vector<1x256xi1> to vector<64x256xi1>
    %82 = vector.broadcast %cst_19 : f32 to vector<64x256xf32>
    %83 = arith.select %81, %79, %82 : vector<64x256xi1>, vector<64x256xf32>
    %84 = arith.addf %78, %83 : vector<64x256xf32>
    %c240_i32_20 = arith.constant 240 : i32
    %85 = tpu.dynamic_rotate %75 by %c240_i32_20 dim 1 : vector<64x256xf32>, i32 -> vector<64x256xf32>
    %cst_21 = arith.constant 0.000000e+00 : f32
    %86 = vector.shape_cast %31 : vector<1x256xi1> to vector<1x256xi1>
    %87 = vector.broadcast %86 : vector<1x256xi1> to vector<64x256xi1>
    %88 = vector.broadcast %cst_21 : f32 to vector<64x256xf32>
    %89 = arith.select %87, %85, %88 : vector<64x256xi1>, vector<64x256xf32>
    %90 = arith.addf %84, %89 : vector<64x256xf32>
    %cst_22 = arith.constant 0.000000e+00 : f32
    %91 = vector.broadcast %cst_22 : f32 to vector<64x256xf32>
    %92 = arith.maximumf %90, %91 : vector<64x256xf32>
    %c0_23 = arith.constant 0 : index
    %c0_24 = arith.constant 0 : index
    %93 = vector.load %arg6[%c0_23, %c0_24] : memref<8x64xf32, #tpu.memory_space<vmem>>, vector<8x64xf32>
    %cst_25 = arith.constant dense<0.000000e+00> : vector<8x256xf32>
    %94 = tpu.matmul %93, %92, %cst_25 {dimension_numbers = #tpu.dot_dimension_numbers<[1], [0], [0], [1], [0, 0, 1, 1], [], []>} : vector<8x64xf32>, vector<64x256xf32>, vector<8x256xf32> -> vector<8x256xf32>
    %c0_26 = arith.constant 0 : index
    %c0_27 = arith.constant 0 : index
    %95 = vector.load %arg7[%c0_26, %c0_27] : memref<8x1xf32, #tpu.memory_space<vmem>>, vector<8x1xf32>
    %96 = vector.broadcast %95 : vector<8x1xf32> to vector<8x256xf32>
    %97 = arith.addf %94, %96 : vector<8x256xf32>
    %c0_28 = arith.constant 0 : index
    %c0_29 = arith.constant 0 : index
    %c0_30 = arith.constant 0 : index
    %98 = vector.load %arg8[%c0_28, %c0_29, %c0_30] : memref<1x8x256xf32, #tpu.memory_space<vmem>>, vector<1x8x256xf32>
    %99 = vector.shape_cast %98 : vector<1x8x256xf32> to vector<8x256xf32>
    %100 = vector.shape_cast %97 : vector<8x256xf32> to vector<1x8x256xf32>
    tpu.vector_store %arg8[%c0_28, %c0_29, %c0_30], %100 {strides = array<i32>} : memref<1x8x256xf32, #tpu.memory_space<vmem>>, vector<1x8x256xf32>,
    return
  }
  func.func @transform_0(%arg0: i32) -> (i32, i32, i32) {
    %c0_i32 = arith.constant 0 : i32
    %c0_i32_0 = arith.constant 0 : i32
    %c0_i32_1 = arith.constant 0 : i32
    return %arg0, %c0_i32, %c0_i32_0 : i32, i32, i32
  }
  func.func @transform_1(%arg0: i32) -> (i32, i32) {
    %c0_i32 = arith.constant 0 : i32
    %c0_i32_0 = arith.constant 0 : i32
    %c0_i32_1 = arith.constant 0 : i32
    return %c0_i32, %c0_i32_0 : i32, i32
  }
  func.func @transform_2(%arg0: i32) -> (i32, i32) {
    %c0_i32 = arith.constant 0 : i32
    %c0_i32_0 = arith.constant 0 : i32
    %c0_i32_1 = arith.constant 0 : i32
    return %c0_i32, %c0_i32_0 : i32, i32
  }
  func.func @transform_3(%arg0: i32) -> (i32, i32) {
    %c0_i32 = arith.constant 0 : i32
    %c0_i32_0 = arith.constant 0 : i32
    %c0_i32_1 = arith.constant 0 : i32
    return %c0_i32, %c0_i32_0 : i32, i32
  }
  func.func @transform_4(%arg0: i32) -> (i32, i32) {
    %c0_i32 = arith.constant 0 : i32
    %c0_i32_0 = arith.constant 0 : i32
    %c0_i32_1 = arith.constant 0 : i32
    return %c0_i32, %c0_i32_0 : i32, i32
  }
  func.func @transform_5(%arg0: i32) -> (i32, i32) {
    %c0_i32 = arith.constant 0 : i32
    %c0_i32_0 = arith.constant 0 : i32
    %c0_i32_1 = arith.constant 0 : i32
    return %c0_i32, %c0_i32_0 : i32, i32
  }
  func.func @transform_6(%arg0: i32) -> (i32, i32) {
    %c0_i32 = arith.constant 0 : i32
    %c0_i32_0 = arith.constant 0 : i32
    %c0_i32_1 = arith.constant 0 : i32
    return %c0_i32, %c0_i32_0 : i32, i32
  }
  func.func @transform_7(%arg0: i32) -> (i32, i32, i32) {
    %c0_i32 = arith.constant 0 : i32
    %c0_i32_0 = arith.constant 0 : i32
    %c0_i32_1 = arith.constant 0 : i32
    return %arg0, %c0_i32, %c0_i32_0 : i32, i32, i32
  }
}

</mosaic_0001>

<bundles_post_ra>
// kernel: tpu_custom_call.1
= control target key start
LH: loop header
LB: loop body
LE: loop exit
PB: predicated region body
PF: predicated region fallthrough
CT: control target
= control target key end

     0   :  { %v2520_v2 = vmov 0   ;;  %vm85_vm0 = vcmask 64512   ;;  %s2512_s0 = inlined_call_operand.vmem [shape: f32[1,8,256], index: 0, kind: input, shape index: {}]   ;;  %s2513_s1 = inlined_call_operand.vmem [shape: f32[64,8], index: 1, kind: input, shape index: {}]   ;;  %s2514_s2 = inlined_call_operand.vmem [shape: f32[64,1], index: 2, kind: input, shape index: {}]   ;;  %s2515_s3 = inlined_call_operand.vmem [shape: f32[64,9], index: 3, kind: input, shape index: {}]   ;;  %s2516_s4 = inlined_call_operand.vmem [shape: f32[64,1], index: 4, kind: input, shape index: {}]   ;;  %s2517_s5 = inlined_call_operand.vmem [shape: f32[8,64], index: 5, kind: input, shape index: {}]   ;;  %s2518_s6 = inlined_call_operand.vmem [shape: f32[8,1], index: 6, kind: input, shape index: {}]   ;;  %s2519_s7 = inlined_call_operand.hbm [shape: f32[1,8,256], index: 7, kind: output, shape index: {}]  }
   0x1   :  { %v27_v0 = vld [vmem:[%s2512_s0] sm:$0xff]  ;;  %v28_v1 = vld [vmem:[%s2512_s0 + $0x8] sm:$0xff]  ;;  %1263 = vset.pattern.permute.xlu1 %v2520_v2  ;;  %1262 = vset.pattern.permute.xlu0 %v2520_v2  ;;  %v39_v3 = vld [vmem:[%s2514_s2 + $0x10] sm:$0xff] }
   0x2   :  { %v37_v4 = vld [vmem:[%s2514_s2] sm:$0xff]  ;;  %125 = vmatpush.msra.mxu0 %v27_v0  ;;  %1246 = vmatpush.msra.mxu2 %v27_v0  ;;  %v34_v6 = vld [vmem:[%s2513_s1 + $0x28] sm:$0xff] }
   0x3   :  { %v29_v5 = vld [vmem:[%s2513_s1] sm:$0xff]  ;;  %166 = vmatpush.msra.mxu1 %v28_v1  ;;  %1247 = vmatpush.msra.mxu3 %v28_v1 }
   0x4   :  { %57 = vperm.xlu1 %1263, %v39_v3   ;;  %47 = vperm.xlu0 %1262, %v37_v4   ;;  %v41_v7 = vld [vmem:[%s2514_s2 + $0x20] sm:$0xff] }
   0x5   :  { %1228 = vmatmul.msk.f32.vlgmr.msra.gmra.mxu0 %vm85_vm0, %v29_v5  ;;  %1233 = vmatmul.msk.f32.vlgmr.msra.gmra.mxu2 %vm85_vm0, %v34_v6 }
   0x6   :  { %1236 = vmatmul.msk.f32.vlgmr.msra.gmra.mxu1 %vm85_vm0, %v29_v5  ;;  %1241 = vmatmul.msk.f32.vlgmr.msra.gmra.mxu3 %vm85_vm0, %v34_v6 }
   0x7   :  { %1264 = vset.pattern.permute.xlu2 %v2520_v2 }
   0x8   :  { %67 = vperm.xlu2 %1264, %v41_v7  }
   0x9   :  { %12 = vsyncpa [#allocation3], 0  ;;  %v40_v8 = vld [vmem:[%s2514_s2 + $0x18] sm:$0xff]  ;;  %v38_v9 = vld [vmem:[%s2514_s2 + $0x8] sm:$0xff]  ;;  %v1323_v20 = vmov 1   ;;  %v1324_v28 = vmov 2  }
   0xa   :  { %v30_v10 = vld [vmem:[%s2513_s1 + $0x8] sm:$0xff]  ;;  %v35_v11 = vld [vmem:[%s2513_s1 + $0x30] sm:$0xff]  ;;  %v44_v13 = vld [vmem:[%s2514_s2 + $0x38] sm:$0xff]  ;;  %s1326_s26 = smov 1   ;;  %v1327_v1 = vmov 3   ;;  %s1333_s27 = smov 16  }
   0xb   :  { %v42_v12 = vld [vmem:[%s2514_s2 + $0x28] sm:$0xff]  ;;  %v43_v14 = vld [vmem:[%s2514_s2 + $0x30] sm:$0xff]  ;;  %v36_v16 = vld [vmem:[%s2513_s1 + $0x38] sm:$0xff]  ;;  %s1334_s2 = smov 112   ;;  %vm1166_vm11 = vcmask 523264   ;;  %s1335_s22 = smov [#allocation2]  }
   0xc   :  { %62 = vperm.xlu1 %1263, %v40_v8   ;;  %52 = vperm.xlu0 %1262, %v38_v9   ;;  %v31_v15 = vld [vmem:[%s2513_s1 + $0x10] sm:$0xff]  ;;  %v1439_v17 = vld [vmem:[%s2515_s3 + $0x8] sm:$0xff]  ;;  %v1448_v18 = vld [vmem:[%s2515_s3] sm:$0xff]  ;;  %s1219_s25 = sshll.u32 %s2519_s7, 4  ;;  %s1220_s25 = int_to_ptr.hbm [resolvable:$true] %s1219_s25 }
   0xd   :  { %1229 = vmatmul.msk.f32.gmra.mxu0 %vm85_vm0, %v30_v10  ;;  %1234 = vmatmul.msk.f32.gmra.mxu2 %vm85_vm0, %v35_v11  ;;  %v32_v19 = vld [vmem:[%s2513_s1 + $0x18] sm:$0xff]  ;;  %v1459_v21 = vld [vmem:[%s2515_s3 + $0x20] sm:$0xff]  ;;  %v1474_v24 = vld [vmem:[%s2515_s3 + $0x28] sm:$0xff] }
   0xe   :  { %1237 = vmatmul.msk.f32.gmra.mxu1 %vm85_vm0, %v30_v10  ;;  %1242 = vmatmul.msk.f32.gmra.mxu3 %vm85_vm0, %v35_v11  ;;  %v1466_v22 = vld [vmem:[%s2515_s3 + $0x18] sm:$0xff]  ;;  %v33_v23 = vld [vmem:[%s2513_s1 + $0x20] sm:$0xff]  ;;  %v1489_v26 = vld [vmem:[%s2515_s3 + $0x30] sm:$0xff]  ;;  %s1217_s1 = sshll.u32 %s1335_s22, 4  ;;  %s1218_s1 = int_to_ptr.vmem [resolvable:$true] %s1217_s1 }
   0xf   :  { %v1482_v25 = vld [vmem:[%s2515_s3 + $0x38] sm:$0xff]  ;;  %v1495_v27 = vld [vmem:[%s2515_s3 + $0x10] sm:$0xff]  ;;  %s1325_s3 = smov 127  }
  0x10   :  { %72 = vperm.xlu2 %1264, %v42_v12  }
  0x14   :  { %82 = vperm.xlu1 %1263, %v44_v13   ;;  %77 = vperm.xlu0 %1262, %v43_v14  }
  0x15   :  { %1230 = vmatmul.msk.f32.gmra.mxu0 %vm85_vm0, %v31_v15  ;;  %1235 = vmatmul.msk.f32.gmra.mxu2 %vm85_vm0, %v36_v16 }
  0x16   :  { %1238 = vmatmul.msk.f32.gmra.mxu1 %vm85_vm0, %v31_v15  ;;  %1243 = vmatmul.msk.f32.gmra.mxu3 %vm85_vm0, %v36_v16 }
  0x18   :  { %380 = vperm.xlu2 %1264, %v1439_v17  }
  0x1c   :  { %375 = vperm.xlu1 %1263, %v1448_v18   ;;  %1265 = vset.pattern.permute.xlu0 %v1323_v20 }
  0x1d   :  { %1231 = vmatmul.msk.f32.gmra.mxu0 %vm85_vm0, %v32_v19  ;;  %430 = vperm.xlu0 %1265, %v1448_v18  }
  0x1e   :  { %1239 = vmatmul.msk.f32.gmra.mxu1 %vm85_vm0, %v32_v19 }
  0x20   :  { %395 = vperm.xlu2 %1264, %v1459_v21  }
  0x24   :  { %390 = vperm.xlu1 %1263, %v1466_v22  }
  0x25   :  { %1232 = vmatmul.msk.f32.gmra.mxu0 %vm85_vm0, %v33_v23  ;;  %450 = vperm.xlu0 %1265, %v1474_v24  }
  0x26   :  { %1240 = vmatmul.msk.f32.gmra.mxu1 %vm85_vm0, %v33_v23 }
  0x28   :  { %410 = vperm.xlu2 %1264, %v1482_v25  }
  0x2c   :  { %405 = vperm.xlu1 %1263, %v1489_v26  }
  0x2d   :  { %1268 = vset.pattern.permute.xlu0 %v1324_v28 }
  0x2e   :  { %494 = vperm.xlu0 %1268, %v1448_v18  }
  0x30   :  { %1267 = vset.pattern.permute.xlu2 %v1323_v20 }
  0x31   :  { %438 = vperm.xlu2 %1267, %v1495_v27  }
  0x34   :  { %1266 = vset.pattern.permute.xlu1 %v1323_v20 }
  0x35   :  { %434 = vperm.xlu1 %1266, %v1439_v17  }
  0x36   :  { %514 = vperm.xlu0 %1268, %v1474_v24  }
  0x39   :  { %446 = vperm.xlu2 %1267, %v1459_v21  }
  0x3d   :  { %442 = vperm.xlu1 %1266, %v1466_v22  }
  0x3e   :  { %1271 = vset.pattern.permute.xlu0 %v1327_v1 }
  0x41   :  { %458 = vperm.xlu2 %1267, %v1482_v25  }
  0x45   :  { %454 = vperm.xlu1 %1266, %v1489_v26  }
  0x49   :  { %1270 = vset.pattern.permute.xlu2 %v1324_v28 }
  0x4a   :  { %502 = vperm.xlu2 %1270, %v1495_v27  }
  0x4d   :  { %1269 = vset.pattern.permute.xlu1 %v1324_v28 }
  0x4e   :  { %498 = vperm.xlu1 %1269, %v1439_v17  }
  0x52   :  { %510 = vperm.xlu2 %1270, %v1459_v21  }
  0x56   :  { %506 = vperm.xlu1 %1269, %v1466_v22  }
  0x62   :  { %v1509_v29 = vpop.permute.xlu2 %67 }
  0x6a   :  { %v73_v35 = vpop.permute.xlu2 %72 }
  0x72   :  { %v1531_v43 = vpop.permute.xlu2 %380 }
  0x73   :  { %2584 = vst [vmem:[#allocation5_spill] sm:$0xff] %v1531_v43 }
  0x76   :  { %v48_v30 = vpop.permute.xlu0 %47  ;;  %v58_v40 = vpop.permute.xlu1 %57 }
  0x7a   :  { %v1543_v48 = vpop.permute.xlu2 %395 }
  0x7b   :  { %2587 = vst [vmem:[#allocation8_spill] sm:$0xff] %v1543_v48 }
  0x7e   :  { %v53_v42 = vpop.permute.xlu0 %52  ;;  %v63_v45 = vpop.permute.xlu1 %62 }
  0x82   :  { %v127_v31 = vpop.f32.mrf.mxu0  ;;  %v1561_v55 = vpop.permute.xlu2 %410 }
  0x83   :  { %v1511_v32 = vadd.f32 %v127_v31, %v48_v30  ;;  %v168_v33 = vpop.f32.mrf.mxu1 }
  0x84   :  { %v1513_v34 = vadd.f32 %v168_v33, %v48_v30 }
  0x85   :  { %304 = vrot.lane.b32.xlu0 %v1511_v32, %s1325_s3  ;;  %235 = vrot.lane.b32.xlu2 %v1511_v32, %s1326_s26 }
  0x86   :  { %251 = vrot.lane.b32.xlu1 %v1513_v34, %s1326_s26  ;;  %v83_v51 = vpop.permute.xlu1 %82  ;;  %v78_v52 = vpop.permute.xlu0 %77 }
  0x88   :  { %v142_v36 = vpop.f32.mrf.mxu2 }
  0x89   :  { %v183_v37 = vpop.f32.mrf.mxu3  ;;  %v1523_v39 = vadd.f32 %v142_v36, %v73_v35 }
  0x8a   :  { %v1521_v38 = vadd.f32 %v183_v37, %v73_v35  ;;  %v130_v41 = vpop.f32.mrf.mxu0  ;;  %v192_v37 = vlaneseq }
  0x8b   :  { %v1533_v44 = vadd.f32 %v130_v41, %v53_v42  ;;  %v171_v46 = vpop.f32.mrf.mxu1  ;;  %v1575_v61 = vpop.permute.xlu2 %438  ;;  %v1328_v41 = vmov 4  }
  0x8c   :  { %v1541_v47 = vadd.f32 %v171_v46, %v53_v42  ;;  %2592 = vst [vmem:[#allocation13_spill] sm:$0xff] %v1575_v61 }
  0x8d   :  { %261 = vrot.lane.b32.xlu0 %v1521_v38, %s1326_s26  ;;  %320 = vrot.lane.b32.xlu2 %v1513_v34, %s1325_s3  ;;  %2585 = vst [vmem:[#allocation6_spill] sm:$0xff] %v1533_v44 }
  0x8e   :  { %245 = vrot.lane.b32.xlu1 %v1523_v39, %s1326_s26  ;;  %2586 = vst [vmem:[#allocation7_spill] sm:$0xff] %v1541_v47  ;;  %v1565_v59 = vpop.permute.xlu1 %375 }
  0x8f   :  { %v431_v19 = vpop.permute.xlu0 %430 }
  0x90   :  { %v145_v49 = vpop.f32.mrf.mxu2 }
  0x91   :  { %v186_v50 = vpop.f32.mrf.mxu3  ;;  %v1551_v53 = vadd.f32 %v145_v49, %v78_v52 }
  0x92   :  { %v1553_v54 = vadd.f32 %v186_v50, %v78_v52  ;;  %v133_v57 = vpop.f32.mrf.mxu0 }
  0x93   :  { %2588 = vst [vmem:[#allocation9_spill] sm:$0xff] %v1551_v53  ;;  %v174_v56 = vpop.f32.mrf.mxu1  ;;  %v1567_v60 = vadd.f32 %v133_v57, %v58_v40  ;;  %v1587_v4 = vpop.permute.xlu2 %446 }
  0x94   :  { %2589 = vst [vmem:[#allocation10_spill] sm:$0xff] %v1553_v54  ;;  %v1563_v58 = vadd.f32 %v174_v56, %v58_v40  ;;  %v1648_v40 = vand.u32 127, %v192_v37 }
  0x95   :  { %237 = vrot.lane.b32.xlu0 %v1533_v44, %s1326_s26  ;;  %314 = vrot.lane.b32.xlu2 %v1523_v39, %s1325_s3  ;;  %2591 = vst [vmem:[#allocation12_spill] sm:$0xff] %v1567_v60 }
  0x96   :  { %330 = vrot.lane.b32.xlu1 %v1521_v38, %s1325_s3  ;;  %2590 = vst [vmem:[#allocation11_spill] sm:$0xff] %v1563_v58  ;;  %v1583_v0 = vpop.permute.xlu1 %390  ;;  %v1656_v46 = vadd.s32 128, %v1648_v40  ;;  %v199_v50 = vand.u32 15, %v1648_v40  ;;  %vm336_vm1 = vcmp.lt.s32.totalorder %v1648_v40, 127  ;;  %vm267_vm2 = vcmp.lt.s32.totalorder %v1648_v40, 1 }
  0x97   :  { %2593 = vst [vmem:[#allocation14_spill] sm:$0xff] %v1583_v0  ;;  %v1636_v30 = vpop.permute.xlu0 %450 }
  0x98   :  { %v148_v62 = vpop.f32.mrf.mxu2  ;;  %2594 = vst [vmem:[#allocation15_spill] sm:$0xff] %v1587_v4  ;;  %vm1666_vm3 = vcmp.gt.s32.totalorder %v199_v50, 0  ;;  %vm1674_vm5 = vcmp.lt.s32.totalorder %v199_v50, 15 }
  0x99   :  { %v1577_v63 = vadd.f32 %v148_v62, %v83_v51  ;;  %v189_v3 = vpop.f32.mrf.mxu3  ;;  %2602 = vst [vmem:[#allocation23_spill] sm:$0xff] %v1636_v30 }
  0x9a   :  { %v1589_v5 = vadd.f32 %v189_v3, %v83_v51  ;;  %v136_v6 = vpop.f32.mrf.mxu0  ;;  %2605 = vst [vmem:[#allocation26_spill] sm:$0xff] %v1648_v40  ;;  %v206_v51 = vand.u32 15, %v1656_v46 }
  0x9b   :  { %v1599_v8 = vadd.f32 %v136_v6, %v63_v45  ;;  %v177_v9 = vpop.f32.mrf.mxu1  ;;  %v1601_v10 = vpop.permute.xlu2 %458  ;;  %2607 = vst [vmem:[#allocation28_spill] sm:$0xff] %v1656_v46 }
  0x9c   :  { %v1603_v11 = vadd.f32 %v177_v9, %v63_v45  ;;  %vm1670_vm4 = vcmp.gt.s32.totalorder %v206_v51, 0  ;;  %vm1678_vm6 = vcmp.lt.s32.totalorder %v206_v51, 15 }
  0x9d   :  { %322 = vrot.lane.b32.xlu0 %v1541_v47, %s1325_s3  ;;  %253 = vrot.lane.b32.xlu2 %v1541_v47, %s1326_s26 }
  0x9e   :  { %306 = vrot.lane.b32.xlu1 %v1533_v44, %s1325_s3  ;;  %v1597_v7 = vpop.permute.xlu1 %405  ;;  %2596 = vst [vmem:[#allocation17_spill] sm:$0xff] %v1603_v11 }
  0x9f   :  { %2595 = vst [vmem:[#allocation16_spill] sm:$0xff] %v1597_v7 }
  0xa0   :  { %v495_v33 = vpop.permute.xlu0 %494 }
  0xa2   :  { %v139_v12 = vpop.f32.mrf.mxu0 }
  0xa3   :  { %v1614_v14 = vadd.f32 %v139_v12, %v1509_v29  ;;  %v180_v16 = vpop.f32.mrf.mxu1 }
  0xa4   :  { %v1616_v15 = vpop.permute.xlu2 %502  ;;  %v1625_v20 = vadd.f32 %v180_v16, %v1509_v29  ;;  %v461_v16 = vmul.f32 %v431_v19, %v1511_v32 }
  0xa5   :  { %316 = vrot.lane.b32.xlu0 %v1551_v53, %s1325_s3  ;;  %247 = vrot.lane.b32.xlu2 %v1551_v53, %s1326_s26  ;;  %2598 = vst [vmem:[#allocation19_spill] sm:$0xff] %v1616_v15 }
  0xa6   :  { %263 = vrot.lane.b32.xlu1 %v1553_v54, %s1326_s26  ;;  %2599 = vst [vmem:[#allocation20_spill] sm:$0xff] %v1625_v20 }
  0xa7   :  { %v1611_v13 = vpop.permute.xlu1 %434 }
  0xa8   :  { %2597 = vst [vmem:[#allocation18_spill] sm:$0xff] %v1611_v13  ;;  %v1652_v42 = vpop.permute.xlu0 %514 }
  0xa9   :  { %2606 = vst [vmem:[#allocation27_spill] sm:$0xff] %v1652_v42 }
  0xac   :  { %v1633_v28 = vpop.permute.xlu2 %510 }
  0xad   :  { %255 = vrot.lane.b32.xlu0 %v1563_v58, %s1326_s26  ;;  %332 = vrot.lane.b32.xlu2 %v1553_v54, %s1325_s3  ;;  %2601 = vst [vmem:[#allocation22_spill] sm:$0xff] %v1633_v28 }
  0xae   :  { %239 = vrot.lane.b32.xlu1 %v1567_v60, %s1326_s26 }
  0xaf   :  { %v1627_v23 = vpop.permute.xlu1 %442 }
  0xb0   :  { %2600 = vst [vmem:[#allocation21_spill] sm:$0xff] %v1627_v23  ;;  %v2536_v23 = vmov 7  }
  0xb5   :  { %249 = vrot.lane.b32.xlu0 %v1577_v63, %s1326_s26  ;;  %308 = vrot.lane.b32.xlu2 %v1567_v60, %s1325_s3 }
  0xb6   :  { %324 = vrot.lane.b32.xlu1 %v1563_v58, %s1325_s3 }
  0xb7   :  { %v1640_v29 = vpop.permute.xlu1 %454 }
  0xb8   :  { %2603 = vst [vmem:[#allocation24_spill] sm:$0xff] %v1640_v29 }
  0xbd   :  { %334 = vrot.lane.b32.xlu0 %v1589_v5, %s1325_s3  ;;  %265 = vrot.lane.b32.xlu2 %v1589_v5, %s1326_s26 }
  0xbe   :  { %318 = vrot.lane.b32.xlu1 %v1577_v63, %s1325_s3 }
  0xc0   :  { %v1644_v35 = vpop.permute.xlu1 %498 }
  0xc1   :  { %2604 = vst [vmem:[#allocation25_spill] sm:$0xff] %v1644_v35 }
  0xc5   :  { %310 = vrot.lane.b32.xlu0 %v1599_v8, %s1325_s3  ;;  %241 = vrot.lane.b32.xlu2 %v1599_v8, %s1326_s26 }
  0xc6   :  { %257 = vrot.lane.b32.xlu1 %v1603_v11, %s1326_s26 }
  0xc8   :  { %v1658_v49 = vpop.permute.xlu1 %506 }
  0xc9   :  { %2608 = vst [vmem:[#allocation29_spill] sm:$0xff] %v1658_v49 }
  0xcd   :  { %243 = vrot.lane.b32.xlu0 %v1614_v14, %s1326_s26  ;;  %326 = vrot.lane.b32.xlu2 %v1603_v11, %s1325_s3 }
  0xce   :  { %312 = vrot.lane.b32.xlu1 %v1614_v14, %s1325_s3 }
  0xd5   :  { %328 = vrot.lane.b32.xlu0 %v1625_v20, %s1325_s3  ;;  %259 = vrot.lane.b32.xlu2 %v1625_v20, %s1326_s26 }
  0xd6   :  { %518 = vperm.xlu1 %1269, %v1489_v26  }
  0xdd   :  { %558 = vperm.xlu0 %1271, %v1448_v18   ;;  %522 = vperm.xlu2 %1270, %v1482_v25  }
  0xde   :  { %1272 = vset.pattern.permute.xlu1 %v1327_v1 }
  0xdf   :  { %562 = vperm.xlu1 %1272, %v1439_v17   ;;  %v236_v31 = vpop.permute.xlu2 %235 }
  0xe5   :  { %578 = vperm.xlu0 %1271, %v1474_v24   ;;  %1273 = vset.pattern.permute.xlu2 %v1327_v1 }
  0xe6   :  { %566 = vperm.xlu2 %1273, %v1495_v27  }
  0xe7   :  { %570 = vperm.xlu1 %1272, %v1466_v22   ;;  %v321_v36 = vpop.permute.xlu2 %320 }
  0xed   :  { %1274 = vset.pattern.permute.xlu0 %v1328_v41 }
  0xee   :  { %606 = vperm.xlu0 %1274, %v1448_v18   ;;  %574 = vperm.xlu2 %1273, %v1459_v21  }
  0xef   :  { %582 = vperm.xlu1 %1272, %v1489_v26   ;;  %v315_v45 = vpop.permute.xlu2 %314 }
  0xf6   :  { %626 = vperm.xlu0 %1274, %v1474_v24   ;;  %586 = vperm.xlu2 %1273, %v1482_v25  }
  0xf7   :  { %1275 = vset.pattern.permute.xlu1 %v1328_v41  ;;  %v305_v1 = vpop.permute.xlu0 %304  ;;  %v254_v3 = vpop.permute.xlu2 %253 }
  0xf8   :  { %v252_v6 = vpop.permute.xlu1 %251  ;;  %610 = vperm.xlu1 %1275, %v1439_v17   ;;  %v337_v9 = vsel %vm336_vm1, %v305_v1, %v321_v36  ;;  %v345_v12 = vsel %vm336_vm1, %v321_v36, %v305_v1  ;;  %v462_v1 = vmul.f32 %v431_v19, %v1513_v34 }
  0xf9   :  { %v268_v37 = vsel %vm267_vm2, %v236_v31, %v252_v6  ;;  %v276_v50 = vsel %vm267_vm2, %v252_v6, %v236_v31  ;;  %v1702_v46 = vsel %vm1674_vm5, %v337_v9, 0.0  ;;  %v1706_v36 = vsel %vm1678_vm6, %v345_v12, 0.0 }
  0xfa   :  { %v1694_v51 = vsel %vm1666_vm3, %v276_v50, 0.0  ;;  %v1698_v2 = vsel %vm1670_vm4, %v268_v37, 0.0  ;;  %v525_v37 = vmul.f32 %v495_v33, %v1702_v46  ;;  %v526_v13 = vmul.f32 %v495_v33, %v1706_v36 }
  0xfb   :  { %2617 = vst [vmem:[#allocation30_spill] sm:$0xff] %v1698_v2  ;;  %v413_v31 = vmul.f32 %v1565_v59, %v1694_v51  ;;  %v414_v6 = vmul.f32 %v1565_v59, %v1698_v2  ;;  %v1329_v9 = vmov 5  }
  0xfd   :  { %v477_v50 = vadd.f32 %v461_v16, %v413_v31  ;;  %v478_v35 = vadd.f32 %v462_v1, %v414_v6 }
  0xfe   :  { %1277 = vset.pattern.permute.xlu0 %v1329_v9  ;;  %1276 = vset.pattern.permute.xlu2 %v1328_v41 }
  0xff   :  { %v1715_v43 = vadd.f32 %v525_v37, %v477_v50  ;;  %v1717_v12 = vadd.f32 %v526_v13, %v478_v35  ;;  %670 = vperm.xlu0 %1277, %v1448_v18   ;;  %v262_v19 = vpop.permute.xlu0 %261  ;;  %614 = vperm.xlu2 %1276, %v1495_v27   ;;  %v1721_v15 = vpop.permute.xlu2 %247  ;;  %v1330_v37 = vmov 6  }
 0x100   :  { %v246_v59 = vpop.permute.xlu1 %245  ;;  %618 = vperm.xlu1 %1275, %v1466_v22  }
 0x101   :  { %2618 = vst [vmem:[#allocation31_spill] sm:$0xff] %v1715_v43  ;;  %v1726_v33 = vsel %vm267_vm2, %v246_v59, %v262_v19  ;;  %v1730_v41 = vsel %vm267_vm2, %v262_v19, %v246_v59 }
 0x102   :  { %2619 = vst [vmem:[#allocation32_spill] sm:$0xff] %v1717_v12 }
 0x107   :  { %690 = vperm.xlu0 %1277, %v1474_v24   ;;  %v238_v13 = vpop.permute.xlu0 %237  ;;  %622 = vperm.xlu2 %1276, %v1459_v21   ;;  %v1734_v35 = vpop.permute.xlu2 %332 }
 0x108   :  { %v331_v16 = vpop.permute.xlu1 %330  ;;  %630 = vperm.xlu1 %1275, %v1489_v26   ;;  %v1739_v1 = vsel %vm267_vm2, %v238_v13, %v254_v3  ;;  %v1743_v31 = vsel %vm267_vm2, %v254_v3, %v238_v13 }
 0x109   :  { %v1747_v6 = vsel %vm336_vm1, %v315_v45, %v331_v16  ;;  %v1751_v50 = vsel %vm336_vm1, %v331_v16, %v315_v45 }
 0x10a   :  { %2620 = vst [vmem:[#allocation33_spill] sm:$0xff] %v1747_v6  ;;  %v2629_v6 = vmov 7  }
 0x10b   :  { %2621 = vst [vmem:[#allocation34_spill] sm:$0xff] %v1751_v50 }
 0x10f   :  { %1280 = vset.pattern.permute.xlu0 %v1330_v37  ;;  %v323_v19 = vpop.permute.xlu0 %322  ;;  %634 = vperm.xlu2 %1276, %v1482_v25   ;;  %v309_v59 = vpop.permute.xlu2 %308 }
 0x110   :  { %1278 = vset.pattern.permute.xlu1 %v1329_v9  ;;  %v307_v12 = vpop.permute.xlu1 %306  ;;  %734 = vperm.xlu0 %1280, %v1448_v18  }
 0x111   :  { %v1757_v3 = vsel %vm336_vm1, %v307_v12, %v323_v19  ;;  %v1761_v13 = vsel %vm336_vm1, %v323_v19, %v307_v12  ;;  %674 = vperm.xlu1 %1278, %v1439_v17  }
 0x112   :  { %2622 = vst [vmem:[#allocation35_spill] sm:$0xff] %v1757_v3 }
 0x113   :  { %2623 = vst [vmem:[#allocation36_spill] sm:$0xff] %v1761_v13 }
 0x117   :  { %v1764_v45 = vpop.permute.xlu0 %316  ;;  %1279 = vset.pattern.permute.xlu2 %v1329_v9  ;;  %v266_v16 = vpop.permute.xlu2 %265 }
 0x118   :  { %v264_v43 = vpop.permute.xlu1 %263  ;;  %v1770_v61 = vsel %vm336_vm1, %v1734_v35, %v1764_v45  ;;  %754 = vperm.xlu0 %1280, %v1474_v24   ;;  %678 = vperm.xlu2 %1279, %v1495_v27  }
 0x119   :  { %2624 = vst [vmem:[#allocation37_spill] sm:$0xff] %v1770_v61  ;;  %v1777_v12 = vsel %vm267_vm2, %v1721_v15, %v264_v43  ;;  %682 = vperm.xlu1 %1278, %v1466_v22  }
 0x11a   :  { %2625 = vst [vmem:[#allocation38_spill] sm:$0xff] %v1777_v12 }
 0x11f   :  { %v256_v9 = vpop.permute.xlu0 %255  ;;  %v242_v19 = vpop.permute.xlu2 %241 }
 0x120   :  { %v240_v49 = vpop.permute.xlu1 %239  ;;  %1283 = vset.pattern.permute.xlu0 %v2536_v23  ;;  %686 = vperm.xlu2 %1279, %v1459_v21  }
 0x121   :  { %v1784_v0 = vsel %vm267_vm2, %v240_v49, %v256_v9  ;;  %v1788_v42 = vsel %vm267_vm2, %v256_v9, %v240_v49  ;;  %694 = vperm.xlu1 %1278, %v1489_v26   ;;  %782 = vperm.xlu0 %1283, %v1448_v18  }
 0x127   :  { %v250_v30 = vpop.permute.xlu0 %249  ;;  %v327_v4 = vpop.permute.xlu2 %326 }
 0x128   :  { %v325_v28 = vpop.permute.xlu1 %324  ;;  %v1794_v23 = vsel %vm267_vm2, %v250_v30, %v266_v16  ;;  %v1798_v48 = vsel %vm267_vm2, %v266_v16, %v250_v30  ;;  %698 = vperm.xlu2 %1279, %v1482_v25   ;;  %v2541_v16 = vmov 8  }
 0x129   :  { %v1803_v49 = vsel %vm336_vm1, %v309_v59, %v325_v28  ;;  %v1807_v9 = vsel %vm336_vm1, %v325_v28, %v309_v59  ;;  %1281 = vset.pattern.permute.xlu1 %v1330_v37  ;;  %790 = vperm.xlu0 %1283, %v1495_v27  }
 0x12a   :  { %738 = vperm.xlu1 %1281, %v1439_v17  }
 0x12f   :  { %v1811_v13 = vpop.permute.xlu0 %334  ;;  %v260_v3 = vpop.permute.xlu2 %259 }
 0x130   :  { %v1813_v30 = vpop.permute.xlu1 %318  ;;  %1282 = vset.pattern.permute.xlu2 %v1330_v37 }
 0x131   :  { %1289 = vset.pattern.permute.xlu0 %v2541_v16  ;;  %742 = vperm.xlu2 %1282, %v1495_v27  }
 0x132   :  { %746 = vperm.xlu1 %1281, %v1466_v22   ;;  %870 = vperm.xlu0 %1289, %v1489_v26  }
 0x137   :  { %v311_v28 = vpop.permute.xlu0 %310  ;;  %v1819_v59 = vpop.permute.xlu2 %522 }
 0x138   :  { %2626 = vst [vmem:[#allocation39_spill] sm:$0xff] %v1819_v59  ;;  %v258_v61 = vpop.permute.xlu1 %257  ;;  %v1823_v54 = vsel %vm336_vm1, %v311_v28, %v327_v4  ;;  %v1827_v37 = vsel %vm336_vm1, %v327_v4, %v311_v28 }
 0x139   :  { %2627 = vst [vmem:[#allocation40_spill] sm:$0xff] %v1823_v54  ;;  %v1831_v16 = vsel %vm267_vm2, %v242_v19, %v258_v61  ;;  %v1835_v12 = vsel %vm267_vm2, %v258_v61, %v242_v19  ;;  %750 = vperm.xlu2 %1282, %v1459_v21   ;;  %v2630_v61 = vmov 0  }
 0x13a   :  { %2628 = vst [vmem:[#allocation41_spill] sm:$0xff] %v1827_v37  ;;  %758 = vperm.xlu1 %1281, %v1489_v26   ;;  %846 = vperm.xlu0 %1289, %v1448_v18   ;;  %v282_v18 = vsel %vm267_vm2, %v264_v43, %v1721_v15  ;;  %v343_v43 = vsel %vm336_vm1, %v1764_v45, %v1734_v35 }
 0x13b   :  { %v1854_v59 = vsel %vm1666_vm3, %v282_v18, 0.0  ;;  %v2634_v18 = vmov 8   ;;  %v473_v35 = vmul.f32 %v1640_v29, %v1551_v53 }
 0x13c   :  { %2631 = vst [vmem:[#allocation42_spill] sm:$0xff] %v1854_v59  ;;  %v425_v15 = vmul.f32 %v1597_v7, %v1854_v59 }
 0x13f   :  { %v244_v50 = vpop.permute.xlu0 %243 }
 0x140   :  { %v313_v54 = vpop.permute.xlu1 %312  ;;  %v272_v4 = vsel %vm267_vm2, %v244_v50, %v260_v3  ;;  %v280_v28 = vsel %vm267_vm2, %v260_v3, %v244_v50  ;;  %v567_v37 = vpop.permute.xlu2 %566 }
 0x141   :  { %762 = vperm.xlu2 %1282, %v1482_v25  }
 0x142   :  { %1284 = vset.pattern.permute.xlu1 %v2629_v6  ;;  %1293 = vset.pattern.permute.xlu0 %v2630_v61 }
 0x143   :  { %810 = vperm.xlu1 %1284, %v1482_v25   ;;  %385 = vperm.xlu0 %1293, %v1495_v27  }
 0x147   :  { %v329_v19 = vpop.permute.xlu0 %328 }
 0x148   :  { %v1856_v50 = vpop.permute.xlu1 %518  ;;  %v1860_v3 = vsel %vm336_vm1, %v313_v54, %v329_v19  ;;  %v1864_v61 = vsel %vm336_vm1, %v329_v19, %v313_v54  ;;  %v575_v11 = vpop.permute.xlu2 %574  ;;  %v1878_v54 = vsel %vm1674_vm5, %v343_v43, 0.0  ;;  %v1892_v43 = vsel %vm1666_vm3, %v1788_v42, 0.0 }
 0x149   :  { %2632 = vst [vmem:[#allocation43_spill] sm:$0xff] %v1856_v50  ;;  %1285 = vset.pattern.permute.xlu2 %v2629_v6  ;;  %v537_v45 = vmul.f32 %v1856_v50, %v1878_v54 }
 0x14a   :  { %2633 = vst [vmem:[#allocation44_spill] sm:$0xff] %v1864_v61  ;;  %806 = vperm.xlu2 %1285, %v1489_v26   ;;  %v489_v26 = vadd.f32 %v473_v35, %v425_v15  ;;  %v1897_v15 = vsel %vm1670_vm4, %v1784_v0, 0.0  ;;  %v1914_v0 = vsel %vm1666_vm3, %v280_v28, 0.0 }
 0x14b   :  { %1286 = vset.pattern.permute.xlu1 %v2634_v18  ;;  %400 = vperm.xlu0 %1293, %v1474_v24   ;;  %2635 = vst [vmem:[#allocation45_spill] sm:$0xff] %v1878_v54 }
 0x14c   :  { %874 = vperm.xlu1 %1286, %v1482_v25   ;;  %v553_v7 = vadd.f32 %v537_v45, %v489_v26  ;;  %2636 = vst [vmem:[#allocation46_spill] sm:$0xff] %v1892_v43  ;;  %v594_v26 = vmul.f32 %v567_v37, %v1897_v15 }
 0x14d   :  { %2637 = vst [vmem:[#allocation47_spill] sm:$0xff] %v1897_v15 }
 0x14f   :  { %v559_v19 = vpop.permute.xlu0 %558 }
 0x150   :  { %v587_v61 = vpop.permute.xlu2 %586 }
 0x151   :  { %v563_v59 = vpop.permute.xlu1 %562 }
 0x152   :  { %802 = vperm.xlu2 %1285, %v1474_v24  }
 0x153   :  { %985 = vrot.lane.b32.xlu0 %v553_v7, %s1333_s27  ;;  %v593_v7 = vmul.f32 %v567_v37, %v1892_v43  ;;  %v1918_v37 = vsel %vm1670_vm4, %v272_v4, 0.0 }
 0x154   :  { %1287 = vset.pattern.permute.xlu1 %v2629_v6  ;;  %2638 = vst [vmem:[#allocation48_spill] sm:$0xff] %v1918_v37  ;;  %v598_v28 = vmul.f32 %v575_v11, %v1918_v37 }
 0x155   :  { %798 = vperm.xlu1 %1287, %v1459_v21  }
 0x157   :  { %v579_v25 = vpop.permute.xlu0 %578 }
 0x159   :  { %v1899_v35 = vpop.permute.xlu1 %570  ;;  %v615_v45 = vpop.permute.xlu2 %614 }
 0x15a   :  { %v641_v54 = vmul.f32 %v615_v45, %v1567_v60  ;;  %v642_v50 = vmul.f32 %v615_v45, %v1563_v58  ;;  %1288 = vset.pattern.permute.xlu2 %v2634_v18  ;;  %v589_v45 = vmul.f32 %v559_v19, %v1694_v51  ;;  %v590_v58 = vmul.f32 %v559_v19, %v1698_v2 }
 0x15b   :  { %866 = vperm.xlu2 %1288, %v1474_v24  }
 0x15c   :  { %v1907_v42 = vadd.f32 %v641_v54, %v593_v7  ;;  %v1909_v29 = vadd.f32 %v642_v50, %v594_v26  ;;  %v597_v26 = vmul.f32 %v575_v11, %v1914_v0  ;;  %v1945_v11 = vsel %vm1670_vm4, %v1726_v33, 0.0 }
 0x15d   :  { %794 = vperm.xlu1 %1287, %v1466_v22   ;;  %v1965_v33 = vsel %vm1670_vm4, %v1739_v1, 0.0 }
 0x15e   :  { %2640 = vst [vmem:[#allocation50_spill] sm:$0xff] %v1965_v33 }
 0x160   :  { %v607_v60 = vpop.permute.xlu0 %606 }
 0x161   :  { %v1922_v24 = vpop.permute.xlu1 %582  ;;  %v637_v50 = vmul.f32 %v607_v60, %v1511_v32  ;;  %v638_v54 = vmul.f32 %v607_v60, %v1513_v34  ;;  %v623_v7 = vpop.permute.xlu2 %622  ;;  %v1940_v60 = vsel %vm1666_vm3, %v1730_v41, 0.0 }
 0x162   :  { %v645_v15 = vmul.f32 %v623_v7, %v1614_v14  ;;  %v646_v4 = vmul.f32 %v623_v7, %v1625_v20 }
 0x163   :  { %v653_v43 = vadd.f32 %v637_v50, %v589_v45  ;;  %v654_v53 = vadd.f32 %v638_v54, %v590_v58  ;;  %862 = vperm.xlu2 %1288, %v1459_v21   ;;  %v1950_v21 = vsel %vm1666_vm3, %v1798_v48, 0.0  ;;  %v1955_v58 = vsel %vm1670_vm4, %v1794_v23, 0.0 }
 0x164   :  { %v1931_v19 = vadd.f32 %v645_v15, %v597_v26  ;;  %v1933_v2 = vadd.f32 %v646_v4, %v598_v28  ;;  %v603_v41 = vmul.f32 %v587_v61, %v1950_v21  ;;  %v604_v48 = vmul.f32 %v587_v61, %v1955_v58 }
 0x165   :  { %1290 = vset.pattern.permute.xlu1 %v2634_v18  ;;  %v599_v45 = vmul.f32 %v579_v25, %v1940_v60  ;;  %v600_v23 = vmul.f32 %v579_v25, %v1945_v11  ;;  %v592_v26 = vmul.f32 %v563_v59, %v1965_v33 }
 0x166   :  { %858 = vperm.xlu1 %1290, %v1466_v22   ;;  %v1960_v22 = vsel %vm1666_vm3, %v1743_v31, 0.0 }
 0x167   :  { %2639 = vst [vmem:[#allocation49_spill] sm:$0xff] %v1960_v22  ;;  %v591_v7 = vmul.f32 %v563_v59, %v1960_v22 }
 0x168   :  { %v627_v15 = vpop.permute.xlu0 %626 }
 0x169   :  { %v647_v50 = vmul.f32 %v627_v15, %v1523_v39  ;;  %v648_v54 = vmul.f32 %v627_v15, %v1521_v38  ;;  %v635_v31 = vpop.permute.xlu2 %634 }
 0x16a   :  { %v611_v1 = vpop.permute.xlu1 %610  ;;  %v651_v28 = vmul.f32 %v635_v31, %v1577_v63  ;;  %v652_v4 = vmul.f32 %v635_v31, %v1589_v5 }
 0x16b   :  { %v1977_v61 = vadd.f32 %v647_v50, %v599_v45  ;;  %v1979_v37 = vadd.f32 %v648_v54, %v600_v23  ;;  %v639_v25 = vmul.f32 %v611_v1, %v1533_v44  ;;  %v640_v20 = vmul.f32 %v611_v1, %v1541_v47  ;;  %1291 = vset.pattern.permute.xlu2 %v2629_v6  ;;  %v2641_v1 = vld [vmem:[#allocation17_spill] sm:$0xff] }
 0x16c   :  { %v1984_v15 = vadd.f32 %v651_v28, %v603_v41  ;;  %v1986_v22 = vadd.f32 %v652_v4, %v604_v48  ;;  %786 = vperm.xlu2 %1291, %v1439_v17   ;;  %v344_v45 = vsel %vm336_vm1, %v1813_v30, %v1811_v13  ;;  %v475_v6 = vmul.f32 %v1601_v10, %v1577_v63 }
 0x16d   :  { %v1989_v59 = vadd.f32 %v639_v25, %v591_v7  ;;  %v1991_v33 = vadd.f32 %v640_v20, %v592_v26  ;;  %v2003_v41 = vsel %vm1674_vm5, %v1803_v49, 0.0  ;;  %v2008_v20 = vsel %vm1678_vm6, %v1807_v9, 0.0 }
 0x16e   :  { %854 = vperm.xlu1 %1290, %v1495_v27   ;;  %v427_v48 = vmul.f32 %v1561_v55, %v1950_v21  ;;  %v428_v23 = vmul.f32 %v1561_v55, %v1955_v58  ;;  %v2016_v27 = vsel %vm1674_vm5, %v344_v45, 0.0  ;;  %v2021_v49 = vsel %vm1666_vm3, %v1835_v12, 0.0 }
 0x16f   :  { %v2026_v9 = vsel %vm1670_vm4, %v1831_v16, 0.0  ;;  %v595_v54 = vmul.f32 %v1899_v35, %v2021_v49  ;;  %v352_v25 = vsel %vm336_vm1, %v1811_v13, %v1813_v30 }
 0x170   :  { %v596_v55 = vmul.f32 %v1899_v35, %v2026_v9  ;;  %v2642_v35 = vld [vmem:[#allocation39_spill] sm:$0xff] }
 0x171   :  { %v671_v50 = vpop.permute.xlu0 %670  ;;  %v539_v45 = vmul.f32 %v2642_v35, %v2016_v27 }
 0x172   :  { %v619_v31 = vpop.permute.xlu1 %618  ;;  %v701_v7 = vmul.f32 %v671_v50, %v1702_v46  ;;  %v702_v26 = vmul.f32 %v671_v50, %v1706_v36  ;;  %v679_v52 = vpop.permute.xlu2 %678  ;;  %v916_v50 = vld [vmem:[%s2516_s4 + $0x38] sm:$0xff] }
 0x173   :  { %v643_v12 = vmul.f32 %v619_v31, %v1599_v8  ;;  %v644_v28 = vmul.f32 %v619_v31, %v2641_v1  ;;  %v705_v16 = vmul.f32 %v679_v52, %v2003_v41  ;;  %v706_v4 = vmul.f32 %v679_v52, %v2008_v20 }
 0x174   :  { %1292 = vset.pattern.permute.xlu2 %v2634_v18  ;;  %v2048_v44 = vadd.f32 %v701_v7, %v653_v43  ;;  %v2050_v31 = vadd.f32 %v702_v26, %v654_v53  ;;  %v2647_v18 = vmov 0   ;;  %v476_v43 = vmul.f32 %v1601_v10, %v1589_v5  ;;  %v2650_v7 = vld [vmem:[#allocation38_spill] sm:$0xff] }
 0x175   :  { %v2052_v47 = vadd.f32 %v643_v12, %v595_v54  ;;  %v2054_v52 = vadd.f32 %v644_v28, %v596_v55  ;;  %850 = vperm.xlu2 %1292, %v1439_v17   ;;  %v2058_v13 = vadd.f32 %v705_v16, %v1907_v42  ;;  %v2061_v30 = vadd.f32 %v706_v4, %v1909_v29  ;;  %v2648_v55 = vld [vmem:[#allocation33_spill] sm:$0xff]  ;;  %v2649_v42 = vld [vmem:[#allocation34_spill] sm:$0xff]  ;;  %v2651_v28 = vld [vmem:[#allocation44_spill] sm:$0xff] }
 0x176   :  { %2643 = vst [vmem:[#allocation17_spill] sm:$0xff] %v2048_v44  ;;  %1294 = vset.pattern.permute.xlu1 %v2647_v18  ;;  %v2068_v53 = vsel %vm1678_vm6, %v352_v25, 0.0  ;;  %v491_v54 = vadd.f32 %v475_v6, %v427_v48  ;;  %v2073_v17 = vsel %vm1674_vm5, %v2648_v55, 0.0  ;;  %v2078_v29 = vsel %vm1678_vm6, %v2649_v42, 0.0  ;;  %v2652_v25 = vld [vmem:[#allocation42_spill] sm:$0xff] }
 0x177   :  { %2644 = vst [vmem:[#allocation39_spill] sm:$0xff] %v2050_v31  ;;  %954 = vperm.xlu1 %1294, %v916_v50   ;;  %v2083_v10 = vsel %vm1670_vm4, %v2650_v7, 0.0  ;;  %v540_v26 = vmul.f32 %v2642_v35, %v2068_v53  ;;  %v492_v6 = vadd.f32 %v476_v43, %v428_v23  ;;  %v2090_v12 = vsel %vm1674_vm5, %v1860_v3, 0.0  ;;  %v2653_v3 = vld [vmem:[#allocation9_spill] sm:$0xff]  ;;  %v2654_v55 = vld [vmem:[#allocation10_spill] sm:$0xff] }
 0x178   :  { %2645 = vst [vmem:[#allocation51_spill] sm:$0xff] %v2058_v13  ;;  %v555_v48 = vadd.f32 %v539_v45, %v491_v54  ;;  %v2095_v16 = vsel %vm1678_vm6, %v2651_v28, 0.0  ;;  %v601_v56 = vmul.f32 %v1922_v24, %v2652_v25  ;;  %v602_v50 = vmul.f32 %v1922_v24, %v2083_v10 }
 0x179   :  { %2646 = vst [vmem:[#allocation52_spill] sm:$0xff] %v2061_v30  ;;  %v691_v4 = vpop.permute.xlu0 %690  ;;  %v556_v31 = vadd.f32 %v540_v26, %v492_v6  ;;  %v2659_v26 = vld [vmem:[#allocation16_spill] sm:$0xff] }
 0x17a   :  { %v631_v35 = vpop.permute.xlu1 %630  ;;  %v711_v23 = vmul.f32 %v691_v4, %v2073_v17  ;;  %v712_v45 = vmul.f32 %v691_v4, %v2078_v29  ;;  %v687_v43 = vpop.permute.xlu2 %686  ;;  %v426_v6 = vmul.f32 %v2659_v26, %v2083_v10 }
 0x17b   :  { %v649_v54 = vmul.f32 %v631_v35, %v2653_v3  ;;  %v650_v42 = vmul.f32 %v631_v35, %v2654_v55  ;;  %v709_v7 = vmul.f32 %v687_v43, %v2090_v12  ;;  %v710_v28 = vmul.f32 %v687_v43, %v2095_v16  ;;  %v2665_v43 = vld [vmem:[#allocation36_spill] sm:$0xff] }
 0x17c   :  { %v2108_v44 = vadd.f32 %v711_v23, %v1977_v61  ;;  %v2111_v24 = vadd.f32 %v712_v45, %v1979_v37  ;;  %v2660_v61 = vld [vmem:[#allocation37_spill] sm:$0xff] }
 0x17d   :  { %v665_v30 = vadd.f32 %v649_v54, %v601_v56  ;;  %v666_v13 = vadd.f32 %v650_v42, %v602_v50  ;;  %987 = vrot.lane.b32.xlu2 %v555_v48, %s1333_s27  ;;  %v2115_v4 = vadd.f32 %v709_v7, %v1931_v19  ;;  %v2118_v35 = vadd.f32 %v710_v28, %v1933_v2  ;;  %v2661_v48 = vld [vmem:[#allocation24_spill] sm:$0xff]  ;;  %v2662_v19 = vld [vmem:[#allocation43_spill] sm:$0xff] }
 0x17e   :  { %2655 = vst [vmem:[#allocation33_spill] sm:$0xff] %v2108_v44  ;;  %1295 = vset.pattern.permute.xlu2 %v2647_v18  ;;  %v2127_v37 = vsel %vm1678_vm6, %v2660_v61, 0.0  ;;  %v474_v56 = vmul.f32 %v2661_v48, %v2654_v55  ;;  %v2663_v2 = vld [vmem:[#allocation35_spill] sm:$0xff]  ;;  %v2144_v54 = vsel %vm1678_vm6, %v2665_v43, 0.0 }
 0x17f   :  { %2656 = vst [vmem:[#allocation34_spill] sm:$0xff] %v2111_v24  ;;  %1003 = vrot.lane.b32.xlu1 %v556_v31, %s1333_s27  ;;  %v538_v50 = vmul.f32 %v2662_v19, %v2127_v37  ;;  %v2136_v18 = vsel %vm1674_vm5, %v2663_v2, 0.0  ;;  %v915_v31 = vld [vmem:[%s2516_s4 + $0x30] sm:$0xff] }
 0x180   :  { %2657 = vst [vmem:[#allocation38_spill] sm:$0xff] %v2115_v4  ;;  %v490_v42 = vadd.f32 %v474_v56, %v426_v6 }
 0x181   :  { %2658 = vst [vmem:[#allocation44_spill] sm:$0xff] %v2118_v35 }
 0x182   :  { %2664 = vst [vmem:[#allocation42_spill] sm:$0xff] %v2136_v18  ;;  %v735_v23 = vpop.permute.xlu0 %734  ;;  %v699_v45 = vpop.permute.xlu2 %698  ;;  %v554_v19 = vadd.f32 %v538_v50, %v490_v42 }
 0x183   :  { %2666 = vst [vmem:[#allocation9_spill] sm:$0xff] %v2144_v54  ;;  %v675_v7 = vpop.permute.xlu1 %674  ;;  %v715_v28 = vmul.f32 %v699_v45, %v2016_v27  ;;  %v716_v26 = vmul.f32 %v699_v45, %v2068_v53  ;;  %v2671_v45 = vld [vmem:[#allocation40_spill] sm:$0xff]  ;;  %v765_v62 = vmul.f32 %v735_v23, %v1694_v51 }
 0x184   :  { %v703_v61 = vmul.f32 %v675_v7, %v2136_v18  ;;  %v704_v48 = vmul.f32 %v675_v7, %v2144_v54  ;;  %v2168_v50 = vsel %vm1674_vm5, %v2671_v45, 0.0  ;;  %v914_v7 = vld [vmem:[%s2516_s4 + $0x28] sm:$0xff]  ;;  %v2676_v45 = vld [vmem:[#allocation45_spill] sm:$0xff] }
 0x185   :  { %949 = vperm.xlu2 %1295, %v915_v31   ;;  %v2151_v2 = vadd.f32 %v715_v28, %v1984_v15  ;;  %v2154_v35 = vadd.f32 %v716_v26, %v1986_v22  ;;  %v2672_v15 = vld [vmem:[#allocation41_spill] sm:$0xff]  ;;  %v2675_v26 = vld [vmem:[#allocation30_spill] sm:$0xff] }
 0x186   :  { %v2157_v43 = vadd.f32 %v703_v61, %v1989_v59  ;;  %v2160_v6 = vadd.f32 %v704_v48, %v1991_v33  ;;  %v2173_v22 = vsel %vm1678_vm6, %v2672_v15, 0.0  ;;  %v766_v61 = vmul.f32 %v735_v23, %v2675_v26  ;;  %v2679_v23 = vld [vmem:[#allocation46_spill] sm:$0xff] }
 0x187   :  { %2667 = vst [vmem:[#allocation10_spill] sm:$0xff] %v2151_v2  ;;  %1001 = vrot.lane.b32.xlu1 %v554_v19, %s1333_s27  ;;  %v2689_v2 = vld [vmem:[#allocation8_spill] sm:$0xff] }
 0x188   :  { %2668 = vst [vmem:[#allocation16_spill] sm:$0xff] %v2154_v35 }
 0x189   :  { %2669 = vst [vmem:[#allocation37_spill] sm:$0xff] %v2157_v43 }
 0x18a   :  { %2670 = vst [vmem:[#allocation24_spill] sm:$0xff] %v2160_v6  ;;  %v2163_v56 = vpop.permute.xlu0 %754 }
 0x18b   :  { %v683_v31 = vpop.permute.xlu1 %682  ;;  %v743_v59 = vpop.permute.xlu2 %742 }
 0x18c   :  { %v707_v42 = vmul.f32 %v683_v31, %v2168_v50  ;;  %v708_v33 = vmul.f32 %v683_v31, %v2173_v22  ;;  %v769_v26 = vmul.f32 %v743_v59, %v2679_v23 }
 0x18e   :  { %v2181_v28 = vadd.f32 %v707_v42, %v2052_v47  ;;  %v2184_v57 = vadd.f32 %v708_v33, %v2054_v52 }
 0x18f   :  { %944 = vperm.xlu1 %1294, %v914_v7  }
 0x190   :  { %2673 = vst [vmem:[#allocation43_spill] sm:$0xff] %v2181_v28 }
 0x191   :  { %2674 = vst [vmem:[#allocation35_spill] sm:$0xff] %v2184_v57  ;;  %v2680_v57 = vld [vmem:[#allocation47_spill] sm:$0xff] }
 0x192   :  { %v770_v28 = vmul.f32 %v743_v59, %v2680_v57 }
 0x193   :  { %v695_v48 = vpop.permute.xlu1 %694  ;;  %v783_v19 = vpop.permute.xlu0 %782 }
 0x194   :  { %v713_v15 = vmul.f32 %v695_v48, %v2676_v45  ;;  %v714_v31 = vmul.f32 %v695_v48, %v2127_v37  ;;  %v813_v6 = vmul.f32 %v783_v19, %v1511_v32  ;;  %v814_v43 = vmul.f32 %v783_v19, %v1513_v34  ;;  %v2192_v47 = vpop.permute.xlu2 %750  ;;  %v2682_v48 = vld [vmem:[#allocation12_spill] sm:$0xff]  ;;  %v2683_v32 = vld [vmem:[#allocation11_spill] sm:$0xff] }
 0x196   :  { %v829_v42 = vadd.f32 %v813_v6, %v765_v62  ;;  %v830_v52 = vadd.f32 %v814_v43, %v766_v61  ;;  %v2194_v33 = vadd.f32 %v713_v15, %v665_v30  ;;  %v2196_v7 = vadd.f32 %v714_v31, %v666_v13 }
 0x198   :  { %2677 = vst [vmem:[#allocation36_spill] sm:$0xff] %v2194_v33 }
 0x199   :  { %2678 = vst [vmem:[#allocation40_spill] sm:$0xff] %v2196_v7 }
 0x19b   :  { %v791_v51 = vpop.permute.xlu0 %790 }
 0x19c   :  { %v2200_v4 = vpop.permute.xlu1 %738  ;;  %v817_v44 = vmul.f32 %v791_v51, %v2682_v48  ;;  %v818_v24 = vmul.f32 %v791_v51, %v2683_v32  ;;  %v763_v34 = vpop.permute.xlu2 %762 }
 0x19d   :  { %2681 = vst [vmem:[#allocation41_spill] sm:$0xff] %v2200_v4 }
 0x19e   :  { %v2204_v19 = vadd.f32 %v817_v44, %v769_v26  ;;  %v2206_v6 = vadd.f32 %v818_v24, %v770_v28 }
 0x1a0   :  { %2684 = vst [vmem:[#allocation30_spill] sm:$0xff] %v2204_v19 }
 0x1a1   :  { %2685 = vst [vmem:[#allocation45_spill] sm:$0xff] %v2206_v6 }
 0x1a4   :  { %v2208_v30 = vpop.permute.xlu1 %746  ;;  %v2210_v13 = vpop.permute.xlu0 %870 }
 0x1a5   :  { %2686 = vst [vmem:[#allocation46_spill] sm:$0xff] %v2208_v30  ;;  %v807_v43 = vpop.permute.xlu2 %806  ;;  %v889_v44 = vmul.f32 %v2210_v13, %v2676_v45  ;;  %v2691_v45 = vld [vmem:[#allocation15_spill] sm:$0xff] }
 0x1a6   :  { %v825_v59 = vmul.f32 %v807_v43, %v2653_v3  ;;  %v421_v3 = vmul.f32 %v2689_v2, %v1914_v0 }
 0x1ac   :  { %v759_v62 = vpop.permute.xlu1 %758  ;;  %v847_v61 = vpop.permute.xlu0 %846 }
 0x1ad   :  { %v777_v15 = vmul.f32 %v759_v62, %v2652_v25  ;;  %v877_v31 = vmul.f32 %v847_v61, %v1702_v46  ;;  %v878_v51 = vmul.f32 %v847_v61, %v1706_v36  ;;  %v2222_v35 = vpop.permute.xlu2 %802  ;;  %v2690_v46 = vld [vmem:[#allocation22_spill] sm:$0xff] }
 0x1ae   :  { %v533_v36 = vmul.f32 %v2690_v46, %v2090_v12 }
 0x1af   :  { %v841_v24 = vadd.f32 %v825_v59, %v777_v15  ;;  %v2218_v28 = vadd.f32 %v877_v31, %v829_v42  ;;  %v2220_v26 = vadd.f32 %v878_v51, %v830_v52  ;;  %v469_v42 = vmul.f32 %v2691_v45, %v1614_v14 }
 0x1b1   :  { %2687 = vst [vmem:[#allocation47_spill] sm:$0xff] %v2218_v28  ;;  %v905_v7 = vadd.f32 %v889_v44, %v841_v24  ;;  %v485_v52 = vadd.f32 %v469_v42, %v421_v3  ;;  %v823_v24 = vmul.f32 %v2222_v35, %v1523_v39  ;;  %v2693_v3 = vld [vmem:[#allocation27_spill] sm:$0xff]  ;;  %v775_v42 = vmul.f32 %v2163_v56, %v1940_v60 }
 0x1b2   :  { %2688 = vst [vmem:[#allocation12_spill] sm:$0xff] %v2220_v26 }
 0x1b3   :  { %1070 = vrot.lane.b32.xlu1 %v905_v7, %s1334_s2  ;;  %v549_v59 = vadd.f32 %v533_v36, %v485_v52  ;;  %v2692_v7 = vld [vmem:[#allocation23_spill] sm:$0xff]  ;;  %v535_v36 = vmul.f32 %v2693_v3, %v2073_v17 }
 0x1b4   :  { %v471_v44 = vmul.f32 %v2692_v7, %v1523_v39  ;;  %v472_v33 = vmul.f32 %v2692_v7, %v1521_v38 }
 0x1b5   :  { %v811_v25 = vpop.permute.xlu1 %810  ;;  %v2229_v61 = vpop.permute.xlu0 %385 }
 0x1b6   :  { %v827_v15 = vmul.f32 %v811_v25, %v1577_v63  ;;  %v828_v31 = vmul.f32 %v811_v25, %v1589_v5  ;;  %v2235_v51 = vpop.permute.xlu2 %866  ;;  %v779_v63 = vmul.f32 %v763_v34, %v1950_v21  ;;  %v780_v5 = vmul.f32 %v763_v34, %v1955_v58 }
 0x1b7   :  { %v887_v52 = vmul.f32 %v2235_v51, %v2073_v17  ;;  %v536_v58 = vmul.f32 %v2693_v3, %v2078_v29  ;;  %v839_v34 = vadd.f32 %v823_v24, %v775_v42  ;;  %v2694_v17 = vld [vmem:[#allocation14_spill] sm:$0xff]  ;;  %v534_v42 = vmul.f32 %v2690_v46, %v2095_v16 }
 0x1b8   :  { %v843_v7 = vadd.f32 %v827_v15, %v779_v63  ;;  %v844_v28 = vadd.f32 %v828_v31, %v780_v5  ;;  %v419_v30 = vmul.f32 %v2694_v17, %v2021_v49  ;;  %v824_v46 = vmul.f32 %v2222_v35, %v1521_v38 }
 0x1b9   :  { %v417_v38 = vmul.f32 %v2229_v61, %v2679_v23 }
 0x1bb   :  { %981 = vrot.lane.b32.xlu1 %v549_v59, %s1333_s27 }
 0x1bd   :  { %v401_v25 = vpop.permute.xlu0 %400 }
 0x1be   :  { %v875_v59 = vpop.permute.xlu1 %874  ;;  %v423_v39 = vmul.f32 %v401_v25, %v1940_v60  ;;  %v424_v40 = vmul.f32 %v401_v25, %v1945_v11  ;;  %v903_v60 = vadd.f32 %v887_v52, %v839_v34  ;;  %v863_v24 = vpop.permute.xlu2 %862 }
 0x1bf   :  { %v891_v26 = vmul.f32 %v875_v59, %v2016_v27  ;;  %v892_v21 = vmul.f32 %v875_v59, %v2068_v53  ;;  %v2695_v27 = vld [vmem:[#allocation21_spill] sm:$0xff] }
 0x1c0   :  { %v487_v6 = vadd.f32 %v471_v44, %v423_v39  ;;  %v488_v18 = vadd.f32 %v472_v33, %v424_v40  ;;  %v467_v53 = vmul.f32 %v2695_v27, %v1599_v8  ;;  %v2696_v40 = vld [vmem:[#allocation29_spill] sm:$0xff]  ;;  %v2700_v39 = vld [vmem:[#allocation19_spill] sm:$0xff] }
 0x1c1   :  { %v907_v4 = vadd.f32 %v891_v26, %v843_v7  ;;  %v908_v54 = vadd.f32 %v892_v21, %v844_v28  ;;  %v531_v33 = vmul.f32 %v2696_v40, %v2168_v50  ;;  %v778_v28 = vmul.f32 %v759_v62, %v2083_v10  ;;  %v2697_v26 = vld [vmem:[#allocation20_spill] sm:$0xff] }
 0x1c2   :  { %v552_v19 = vadd.f32 %v536_v58, %v488_v18  ;;  %v551_v25 = vadd.f32 %v535_v36, %v487_v6  ;;  %v483_v15 = vadd.f32 %v467_v53, %v419_v30  ;;  %v826_v6 = vmul.f32 %v807_v43, %v2654_v55  ;;  %v913_v55 = vld [vmem:[%s2516_s4 + $0x20] sm:$0xff] }
 0x1c3   :  { %1088 = vrot.lane.b32.xlu0 %v908_v54, %s1334_s2  ;;  %1072 = vrot.lane.b32.xlu2 %v907_v4, %s1334_s2  ;;  %v2698_v4 = vld [vmem:[#allocation48_spill] sm:$0xff]  ;;  %v890_v10 = vmul.f32 %v2210_v13, %v2127_v37  ;;  %v886_v36 = vmul.f32 %v863_v24, %v2095_v16  ;;  %v418_v43 = vmul.f32 %v2229_v61, %v2680_v57  ;;  %v2699_v37 = vld [vmem:[#allocation13_spill] sm:$0xff] }
 0x1c4   :  { %1068 = vrot.lane.b32.xlu1 %v903_v60, %s1334_s2  ;;  %v547_v18 = vadd.f32 %v531_v33, %v483_v15  ;;  %v774_v54 = vmul.f32 %v2192_v47, %v2698_v4  ;;  %v842_v30 = vadd.f32 %v826_v6, %v778_v28  ;;  %v422_v5 = vmul.f32 %v2689_v2, %v2698_v4  ;;  %v912_v2 = vld [vmem:[%s2516_s4 + $0x18] sm:$0xff] }
 0x1c5   :  { %v466_v13 = vmul.f32 %v2699_v37, %v2683_v32  ;;  %v470_v52 = vmul.f32 %v2691_v45, %v2697_v26  ;;  %v530_v7 = vmul.f32 %v2700_v39, %v2008_v20  ;;  %v773_v16 = vmul.f32 %v2192_v47, %v1914_v0  ;;  %v910_v47 = vld [vmem:[%s2516_s4 + $0x8] sm:$0xff] }
 0x1c6   :  { %v776_v45 = vmul.f32 %v2163_v56, %v1945_v11  ;;  %v885_v53 = vmul.f32 %v863_v24, %v2090_v12  ;;  %v420_v0 = vmul.f32 %v2694_v17, %v2026_v9  ;;  %v468_v11 = vmul.f32 %v2695_v27, %v2641_v1  ;;  %v787_v27 = vpop.permute.xlu2 %786 }
 0x1c7   :  { %v799_v31 = vpop.permute.xlu1 %798  ;;  %v482_v59 = vadd.f32 %v466_v13, %v418_v43  ;;  %v486_v57 = vadd.f32 %v470_v52, %v422_v5  ;;  %v532_v17 = vmul.f32 %v2696_v40, %v2173_v22  ;;  %v911_v40 = vld [vmem:[%s2516_s4 + $0x10] sm:$0xff] }
 0x1c8   :  { %v822_v44 = vmul.f32 %v799_v31, %v2697_v26  ;;  %v821_v21 = vmul.f32 %v799_v31, %v1614_v14  ;;  %v888_v14 = vmul.f32 %v2235_v51, %v2078_v29  ;;  %v465_v29 = vmul.f32 %v2699_v37, %v2682_v48  ;;  %v2701_v48 = vld [vmem:[#allocation30_spill] sm:$0xff]  ;;  %v2709_v43 = vld [vmem:[#allocation25_spill] sm:$0xff] }
 0x1c9   :  { %v550_v58 = vadd.f32 %v534_v42, %v486_v57  ;;  %v546_v34 = vadd.f32 %v530_v7, %v482_v59  ;;  %v484_v23 = vadd.f32 %v468_v11, %v420_v0  ;;  %v529_v51 = vmul.f32 %v2700_v39, %v2003_v41 }
 0x1ca   :  { %v838_v3 = vadd.f32 %v822_v44, %v774_v54  ;;  %v837_v60 = vadd.f32 %v821_v21, %v773_v16  ;;  %v481_v12 = vadd.f32 %v465_v29, %v417_v38  ;;  %v2702_v44 = vld [vmem:[#allocation46_spill] sm:$0xff] }
 0x1cb   :  { %999 = vrot.lane.b32.xlu0 %v552_v19, %s1333_s27  ;;  %983 = vrot.lane.b32.xlu2 %v551_v25, %s1333_s27  ;;  %v906_v19 = vadd.f32 %v890_v10, %v842_v30  ;;  %v840_v25 = vadd.f32 %v824_v46, %v776_v45  ;;  %v548_v31 = vadd.f32 %v532_v17, %v484_v23  ;;  %v2703_v54 = vld [vmem:[#allocation50_spill] sm:$0xff]  ;;  %v2704_v30 = vld [vmem:[#allocation5_spill] sm:$0xff]  ;;  %v2705_v10 = vld [vmem:[#allocation7_spill] sm:$0xff] }
 0x1cc   :  { %979 = vrot.lane.b32.xlu1 %v547_v18, %s1333_s27  ;;  %v902_v63 = vadd.f32 %v886_v36, %v838_v3  ;;  %v901_v15 = vadd.f32 %v885_v53, %v837_v60  ;;  %v545_v33 = vadd.f32 %v529_v51, %v481_v12  ;;  %v772_v18 = vmul.f32 %v2702_v44, %v2026_v9  ;;  %v2706_v9 = vld [vmem:[#allocation31_spill] sm:$0xff]  ;;  %v2715_v23 = vld [vmem:[#allocation32_spill] sm:$0xff] }
 0x1cd   :  { %v904_v35 = vadd.f32 %v888_v14, %v840_v25  ;;  %v816_v36 = vmul.f32 %v787_v27, %v2705_v10  ;;  %v771_v5 = vmul.f32 %v2702_v44, %v2021_v49  ;;  %v2712_v49 = vld [vmem:[#allocation6_spill] sm:$0xff]  ;;  %v909_v46 = vld [vmem:[%s2516_s4] sm:$0xff] }
 0x1ce   :  { %v1160_v14 = vld [vmem:[%s2518_s6] sm:$0xff]  ;;  %v815_v60 = vmul.f32 %v787_v27, %v2712_v49 }
 0x1cf   :  { %v795_v62 = vpop.permute.xlu1 %794  ;;  %v851_v3 = vpop.permute.xlu2 %850 }
 0x1d0   :  { %v820_v26 = vmul.f32 %v795_v62, %v2641_v1  ;;  %v416_v1 = vmul.f32 %v2704_v30, %v2703_v54  ;;  %v819_v24 = vmul.f32 %v795_v62, %v1599_v8  ;;  %v2710_v62 = vld [vmem:[#allocation41_spill] sm:$0xff] }
 0x1d1   :  { %v768_v37 = vmul.f32 %v2710_v62, %v2703_v54  ;;  %v2720_v54 = vld [vmem:[#allocation36_spill] sm:$0xff] }
 0x1d2   :  { %v836_v6 = vadd.f32 %v820_v26, %v772_v18  ;;  %v835_v42 = vadd.f32 %v819_v24, %v771_v5 }
 0x1d3   :  { %939 = vperm.xlu0 %1293, %v913_v55   ;;  %1086 = vrot.lane.b32.xlu2 %v906_v19, %s1334_s2  ;;  %v2708_v19 = vld [vmem:[#allocation9_spill] sm:$0xff]  ;;  %v832_v59 = vadd.f32 %v816_v36, %v768_v37  ;;  %v2722_v36 = vld [vmem:[#allocation40_spill] sm:$0xff] }
 0x1d4   :  { %1082 = vrot.lane.b32.xlu1 %v902_v63, %s1334_s2  ;;  %v528_v63 = vmul.f32 %v2709_v43, %v2708_v19  ;;  %v880_v13 = vmul.f32 %v851_v3, %v2708_v19 }
 0x1d6   :  { %v896_v7 = vadd.f32 %v880_v13, %v832_v59 }
 0x1d7   :  { %v988_v29 = vpop.permute.xlu2 %987 }
 0x1d8   :  { %v859_v32 = vpop.permute.xlu1 %858 }
 0x1d9   :  { %v883_v8 = vmul.f32 %v859_v32, %v2168_v50 }
 0x1db   :  { %934 = vperm.xlu0 %1293, %v912_v2   ;;  %997 = vrot.lane.b32.xlu2 %v550_v58, %s1333_s27  ;;  %v899_v57 = vadd.f32 %v883_v8, %v835_v42  ;;  %v2711_v2 = vld [vmem:[#allocation49_spill] sm:$0xff] }
 0x1dc   :  { %993 = vrot.lane.b32.xlu1 %v546_v34, %s1333_s27  ;;  %v415_v21 = vmul.f32 %v2704_v30, %v2711_v2  ;;  %v767_v25 = vmul.f32 %v2710_v62, %v2711_v2 }
 0x1de   :  { %v831_v38 = vadd.f32 %v815_v60, %v767_v25 }
 0x1df   :  { %v950_v51 = vpop.permute.xlu2 %949 }
 0x1e0   :  { %v855_v56 = vpop.permute.xlu1 %854  ;;  %v969_v30 = vadd.f32 %v950_v51, %v2720_v54 }
 0x1e1   :  { %v881_v61 = vmul.f32 %v855_v56, %v2003_v41  ;;  %v884_v41 = vmul.f32 %v859_v32, %v2173_v22  ;;  %v2707_v22 = vld [vmem:[#allocation18_spill] sm:$0xff]  ;;  %v882_v0 = vmul.f32 %v855_v56, %v2008_v20  ;;  %v2717_v20 = vld [vmem:[#allocation47_spill] sm:$0xff] }
 0x1e2   :  { %v464_v55 = vmul.f32 %v2707_v22, %v2705_v10  ;;  %v463_v50 = vmul.f32 %v2707_v22, %v2712_v49  ;;  %v2713_v32 = vld [vmem:[#allocation42_spill] sm:$0xff]  ;;  %v2723_v22 = vld [vmem:[#allocation16_spill] sm:$0xff] }
 0x1e3   :  { %1084 = vrot.lane.b32.xlu2 %v904_v35, %s1334_s2  ;;  %1066 = vrot.lane.b32.xlu0 %v901_v15, %s1334_s2  ;;  %v897_v28 = vadd.f32 %v881_v61, %v2701_v48  ;;  %v900_v4 = vadd.f32 %v884_v41, %v836_v6  ;;  %v527_v58 = vmul.f32 %v2709_v43, %v2713_v32  ;;  %v2716_v61 = vld [vmem:[#allocation12_spill] sm:$0xff]  ;;  %v2718_v48 = vld [vmem:[#allocation26_spill] sm:$0xff] }
 0x1e4   :  { %924 = vperm.xlu1 %1294, %v910_v47   ;;  %v480_v52 = vadd.f32 %v464_v55, %v416_v1  ;;  %v479_v34 = vadd.f32 %v463_v50, %v415_v21  ;;  %v879_v53 = vmul.f32 %v851_v3, %v2713_v32  ;;  %v2714_v47 = vld [vmem:[#allocation45_spill] sm:$0xff]  ;;  %vm1005_vm7 = vcmp.lt.s32.totalorder %v2718_v48, 16  ;;  %v2721_v1 = vld [vmem:[#allocation10_spill] sm:$0xff] }
 0x1e5   :  { %v898_v15 = vadd.f32 %v882_v0, %v2714_v47  ;;  %vm223_vm8 = vcmp.ge.s32.totalorder %v2718_v48, 16  ;;  %vm1090_vm9 = vcmp.lt.s32.totalorder %v2718_v48, 112 }
 0x1e6   :  { %v544_v39 = vadd.f32 %v528_v63, %v480_v52  ;;  %v543_v45 = vadd.f32 %v527_v58, %v479_v34  ;;  %v895_v35 = vadd.f32 %v879_v53, %v831_v38  ;;  %v2724_v34 = vld [vmem:[#allocation34_spill] sm:$0xff] }
 0x1e9   :  { %v955_v16 = vpop.permute.xlu1 %954 }
 0x1ea   :  { %v971_v24 = vadd.f32 %v955_v16, %v2721_v1  ;;  %v972_v55 = vadd.f32 %v955_v16, %v2723_v22 }
 0x1eb   :  { %995 = vrot.lane.b32.xlu2 %v548_v31, %s1333_s27  ;;  %977 = vrot.lane.b32.xlu0 %v545_v33, %s1333_s27  ;;  %v986_v33 = vpop.permute.xlu0 %985 }
 0x1ec   :  { %1062 = vrot.lane.b32.xlu1 %v897_v28, %s1334_s2 }
 0x1f1   :  { %v1004_v11 = vpop.permute.xlu1 %1003 }
 0x1f2   :  { %v1021_v44 = vsel %vm1005_vm7, %v1004_v11, %v988_v29  ;;  %v1013_v3 = vsel %vm1005_vm7, %v988_v29, %v1004_v11 }
 0x1f3   :  { %929 = vperm.xlu2 %1295, %v911_v40   ;;  %1080 = vrot.lane.b32.xlu0 %v900_v4, %s1334_s2  ;;  %v1040_v41 = vsel %vm223_vm8, %v1021_v44, 0.0  ;;  %v2719_v40 = vld [vmem:[#allocation28_spill] sm:$0xff]  ;;  %v1057_v37 = vadd.f32 %v1013_v3, %v972_v55  ;;  %v2726_v44 = vld [vmem:[#allocation38_spill] sm:$0xff] }
 0x1f4   :  { %973 = vrot.lane.b32.xlu1 %v2706_v9, %s1333_s27  ;;  %vm226_vm10 = vcmp.lt.s32.totalorder %v2719_v40, 240  ;;  %v970_v9 = vadd.f32 %v950_v51, %v2722_v36  ;;  %v1056_v43 = vadd.f32 %v1040_v41, %v971_v24  ;;  %v2727_v41 = vld [vmem:[#allocation44_spill] sm:$0xff] }
 0x1f9   :  { %v1002_v12 = vpop.permute.xlu1 %1001 }
 0x1fa   :  { %v1020_v18 = vsel %vm1005_vm7, %v1002_v12, %v986_v33  ;;  %v1012_v10 = vsel %vm1005_vm7, %v986_v33, %v1002_v12 }
 0x1fb   :  { %1064 = vrot.lane.b32.xlu2 %v899_v57, %s1334_s2  ;;  %991 = vrot.lane.b32.xlu0 %v544_v39, %s1333_s27  ;;  %v1038_v6 = vsel %vm223_vm8, %v1020_v18, 0.0  ;;  %v1055_v13 = vadd.f32 %v1012_v10, %v970_v9 }
 0x1fc   :  { %1076 = vrot.lane.b32.xlu1 %v896_v7, %s1334_s2  ;;  %v1054_v63 = vadd.f32 %v1038_v6, %v969_v30 }
 0x201   :  { %v945_v56 = vpop.permute.xlu1 %944 }
 0x202   :  { %v968_v16 = vadd.f32 %v945_v56, %v2724_v34 }
 0x203   :  { %975 = vrot.lane.b32.xlu2 %v543_v45, %s1333_s27  ;;  %919 = vperm.xlu0 %1293, %v909_v46  }
 0x204   :  { %1163 = vperm.xlu1 %1294, %v1160_v14   ;;  %v2725_v14 = vld [vmem:[#allocation33_spill] sm:$0xff] }
 0x205   :  { %v967_v60 = vadd.f32 %v945_v56, %v2725_v14 }
 0x20b   :  { %1078 = vrot.lane.b32.xlu2 %v898_v15, %s1334_s2  ;;  %1060 = vrot.lane.b32.xlu0 %v895_v35, %s1334_s2 }
 0x213   :  { %989 = vrot.lane.b32.xlu2 %v2715_v23, %s1333_s27  ;;  %1074 = vrot.lane.b32.xlu0 %v2716_v61, %s1334_s2 }
 0x21b   :  { %1058 = vrot.lane.b32.xlu2 %v2717_v20, %s1334_s2 }
 0x21d   :  { %v1073_v17 = vpop.permute.xlu2 %1072 }
 0x225   :  { %v1071_v27 = vpop.permute.xlu1 %1070  ;;  %v984_v31 = vpop.permute.xlu2 %983 }
 0x22d   :  { %v2387_v28 = vpop.permute.xlu1 %981  ;;  %v1087_v26 = vpop.permute.xlu2 %1086 }
 0x22e   :  { %v1105_v4 = vsel %vm1090_vm9, %v1087_v26, %v1071_v27  ;;  %v1097_v19 = vsel %vm1090_vm9, %v1071_v27, %v1087_v26 }
 0x22f   :  { %v1124_v5 = vsel %vm226_vm10, %v1105_v4, 0.0  ;;  %v1139_v7 = vadd.f32 %v1097_v19, %v1054_v63 }
 0x230   :  { %v1140_v21 = vadd.f32 %v1124_v5, %v1055_v13 }
 0x231   :  { %v1155_v32 = vmax.f32 %v1139_v7, 0.0 }
 0x232   :  { %v1156_v58 = vmax.f32 %v1140_v21, 0.0 }
 0x235   :  { %v1089_v8 = vpop.permute.xlu0 %1088  ;;  %v998_v62 = vpop.permute.xlu2 %997 }
 0x236   :  { %v1098_v42 = vsel %vm1090_vm9, %v1073_v17, %v1089_v8  ;;  %v1106_v52 = vsel %vm1090_vm9, %v1089_v8, %v1073_v17  ;;  %v1069_v59 = vpop.permute.xlu1 %1068  ;;  %v1018_v26 = vsel %vm1005_vm7, %v998_v62, %v2387_v28  ;;  %v1010_v54 = vsel %vm1005_vm7, %v2387_v28, %v998_v62 }
 0x237   :  { %v1126_v57 = vsel %vm226_vm10, %v1106_v52, 0.0  ;;  %v1141_v39 = vadd.f32 %v1098_v42, %v1056_v43  ;;  %v1034_v4 = vsel %vm223_vm8, %v1018_v26, 0.0  ;;  %v2729_v42 = vld [vmem:[#allocation35_spill] sm:$0xff] }
 0x238   :  { %v1142_v2 = vadd.f32 %v1126_v57, %v1057_v37  ;;  %v2728_v37 = vld [vmem:[#allocation43_spill] sm:$0xff] }
 0x239   :  { %v1157_v49 = vmax.f32 %v1141_v39, 0.0  ;;  %v2730_v39 = vld [vmem:[#allocation51_spill] sm:$0xff] }
 0x23a   :  { %v1158_v50 = vmax.f32 %v1142_v2, 0.0  ;;  %v2731_v2 = vld [vmem:[#allocation52_spill] sm:$0xff] }
 0x23b   :  { %1178 = vmatpush.msrb.mxu2 %v1157_v49 }
 0x23c   :  { %1198 = vmatpush.msrb.mxu3 %v1158_v50 }
 0x23d   :  { %v1000_v46 = vpop.permute.xlu0 %999  ;;  %1179 = vmatpush.msrb.mxu2 %v1155_v32  ;;  %v1085_v45 = vpop.permute.xlu2 %1084 }
 0x23e   :  { %v1011_v25 = vsel %vm1005_vm7, %v984_v31, %v1000_v46  ;;  %v1019_v53 = vsel %vm1005_vm7, %v1000_v46, %v984_v31  ;;  %v980_v0 = vpop.permute.xlu1 %979  ;;  %v1104_v38 = vsel %vm1090_vm9, %v1085_v45, %v1069_v59  ;;  %1199 = vmatpush.msrb.mxu3 %v1156_v58  ;;  %v1096_v29 = vsel %vm1090_vm9, %v1069_v59, %v1085_v45 }
 0x23f   :  { %v1036_v35 = vsel %vm223_vm8, %v1019_v53, 0.0  ;;  %v1053_v47 = vadd.f32 %v1011_v25, %v968_v16  ;;  %v1122_v15 = vsel %vm226_vm10, %v1104_v38, 0.0 }
 0x240   :  { %v1052_v11 = vadd.f32 %v1036_v35, %v967_v60 }
 0x241   :  { %v1138_v12 = vadd.f32 %v1122_v15, %v1053_v47 }
 0x242   :  { %v1137_v23 = vadd.f32 %v1096_v29, %v1052_v11 }
 0x243   :  { %v1154_v61 = vmax.f32 %v1138_v12, 0.0 }
 0x244   :  { %v1153_v51 = vmax.f32 %v1137_v23, 0.0 }
 0x245   :  { %v940_v20 = vpop.permute.xlu0 %939  ;;  %1200 = vmatpush.msrb.mxu3 %v1154_v61  ;;  %v996_v56 = vpop.permute.xlu2 %995 }
 0x246   :  { %v1083_v17 = vpop.permute.xlu1 %1082  ;;  %1180 = vmatpush.msrb.mxu2 %v1153_v51  ;;  %v965_v18 = vadd.f32 %v940_v20, %v2726_v44  ;;  %v966_v6 = vadd.f32 %v940_v20, %v2727_v41  ;;  %v1017_v62 = vsel %vm1005_vm7, %v996_v56, %v980_v0  ;;  %v1009_v49 = vsel %vm1005_vm7, %v980_v0, %v996_v56  ;;  %v2733_v41 = vld [vmem:[#allocation24_spill] sm:$0xff] }
 0x247   :  { %v1032_v50 = vsel %vm223_vm8, %v1017_v62, 0.0 }
 0x248   :  { %v1050_v30 = vadd.f32 %v1034_v4, %v965_v18  ;;  %v1051_v3 = vadd.f32 %v1010_v54, %v966_v6 }
 0x24d   :  { %v935_v27 = vpop.permute.xlu0 %934  ;;  %v930_v31 = vpop.permute.xlu2 %929 }
 0x24e   :  { %v994_v33 = vpop.permute.xlu1 %993  ;;  %v963_v13 = vadd.f32 %v935_v27, %v2728_v37  ;;  %v964_v52 = vadd.f32 %v935_v27, %v2729_v42  ;;  %v961_v7 = vadd.f32 %v930_v31, %v2730_v39  ;;  %v962_v21 = vadd.f32 %v930_v31, %v2731_v2 }
 0x250   :  { %v1048_v58 = vadd.f32 %v1032_v50, %v963_v13  ;;  %v1049_v34 = vadd.f32 %v1009_v49, %v964_v52  ;;  %v1159_v49 = vld [vmem:[%s2517_s5] sm:$0xff] }
 0x255   :  { %v1067_v1 = vpop.permute.xlu0 %1066  ;;  %v1065_v24 = vpop.permute.xlu2 %1064 }
 0x256   :  { %v1095_v10 = vsel %vm1090_vm9, %v1067_v1, %v1083_v17  ;;  %v1103_v36 = vsel %vm1090_vm9, %v1083_v17, %v1067_v1  ;;  %v925_v43 = vpop.permute.xlu1 %924 }
 0x257   :  { %v1120_v9 = vsel %vm226_vm10, %v1103_v36, 0.0  ;;  %v1135_v22 = vadd.f32 %v1095_v10, %v1050_v30  ;;  %v960_v6 = vadd.f32 %v925_v43, %v2733_v41 }
 0x258   :  { %v1136_v55 = vadd.f32 %v1120_v9, %v1051_v3 }
 0x259   :  { %v1151_v19 = vmax.f32 %v1135_v22, 0.0 }
 0x25a   :  { %v1152_v63 = vmax.f32 %v1136_v55, 0.0  ;;  %v2734_v55 = vld [vmem:[#allocation17_spill] sm:$0xff] }
 0x25b   :  { %1181 = vmatpush.msrb.mxu2 %v1151_v19 }
 0x25c   :  { %1201 = vmatpush.msrb.mxu3 %v1152_v63  ;;  %v2735_v63 = vld [vmem:[#allocation39_spill] sm:$0xff] }
 0x25d   :  { %v978_v28 = vpop.permute.xlu0 %977  ;;  %v976_v5 = vpop.permute.xlu2 %975 }
 0x25e   :  { %v1016_v8 = vsel %vm1005_vm7, %v994_v33, %v978_v28  ;;  %v1008_v59 = vsel %vm1005_vm7, %v978_v28, %v994_v33  ;;  %v1063_v32 = vpop.permute.xlu1 %1062  ;;  %v2732_v33 = vld [vmem:[#allocation37_spill] sm:$0xff] }
 0x25f   :  { %v1030_v57 = vsel %vm223_vm8, %v1016_v8, 0.0  ;;  %v1047_v46 = vadd.f32 %v1008_v59, %v962_v21  ;;  %v959_v26 = vadd.f32 %v925_v43, %v2732_v33 }
 0x260   :  { %v1046_v16 = vadd.f32 %v1030_v57, %v961_v7 }
 0x265   :  { %v1081_v45 = vpop.permute.xlu0 %1080  ;;  %v1079_v14 = vpop.permute.xlu2 %1078 }
 0x266   :  { %v1094_v60 = vsel %vm1090_vm9, %v1065_v24, %v1081_v45  ;;  %v1102_v25 = vsel %vm1090_vm9, %v1081_v45, %v1065_v24  ;;  %v1093_v53 = vsel %vm1090_vm9, %v1063_v32, %v1079_v14  ;;  %v1101_v0 = vsel %vm1090_vm9, %v1079_v14, %v1063_v32  ;;  %v974_v56 = vpop.permute.xlu1 %973 }
 0x267   :  { %v1118_v38 = vsel %vm226_vm10, %v1102_v25, 0.0  ;;  %v1116_v35 = vsel %vm226_vm10, %v1101_v0, 0.0  ;;  %v1133_v47 = vadd.f32 %v1094_v60, %v1048_v58  ;;  %v1131_v15 = vadd.f32 %v1093_v53, %v1046_v16 }
 0x268   :  { %v1134_v11 = vadd.f32 %v1118_v38, %v1049_v34  ;;  %v1132_v29 = vadd.f32 %v1116_v35, %v1047_v46 }
 0x269   :  { %v1149_v12 = vmax.f32 %v1133_v47, 0.0  ;;  %v1147_v61 = vmax.f32 %v1131_v15, 0.0 }
 0x26a   :  { %v1150_v23 = vmax.f32 %v1134_v11, 0.0  ;;  %v1148_v51 = vmax.f32 %v1132_v29, 0.0 }
 0x26b   :  { %1182 = vmatpush.msrb.mxu2 %v1149_v12 }
 0x26c   :  { %1202 = vmatpush.msrb.mxu3 %v1150_v23 }
 0x26d   :  { %v992_v20 = vpop.permute.xlu0 %991  ;;  %1183 = vmatpush.msrb.mxu2 %v1147_v61  ;;  %v990_v18 = vpop.permute.xlu2 %989 }
 0x26e   :  { %1203 = vmatpush.msrb.mxu3 %v1148_v51  ;;  %v1015_v27 = vsel %vm1005_vm7, %v992_v20, %v976_v5  ;;  %v1007_v44 = vsel %vm1005_vm7, %v976_v5, %v992_v20  ;;  %v1077_v54 = vpop.permute.xlu1 %1076  ;;  %v1014_v22 = vsel %vm1005_vm7, %v990_v18, %v974_v56  ;;  %v1006_v62 = vsel %vm1005_vm7, %v974_v56, %v990_v18 }
 0x26f   :  { %v1028_v31 = vsel %vm223_vm8, %v1015_v27, 0.0  ;;  %v1045_v1 = vadd.f32 %v1007_v44, %v960_v6  ;;  %v1026_v8 = vsel %vm223_vm8, %v1014_v22, 0.0 }
 0x270   :  { %v1044_v4 = vadd.f32 %v1028_v31, %v959_v26 }
 0x275   :  { %v920_v17 = vpop.permute.xlu0 %919  ;;  %v1059_v13 = vpop.permute.xlu2 %1058 }
 0x276   :  { %v957_v19 = vadd.f32 %v920_v17, %v2734_v55  ;;  %v958_v28 = vadd.f32 %v920_v17, %v2735_v63  ;;  %v1164_v48 = vpop.permute.xlu1 %1163 }
 0x278   :  { %v1042_v37 = vadd.f32 %v1026_v8, %v957_v19  ;;  %v1043_v52 = vadd.f32 %v1006_v62, %v958_v28 }
 0x27d   :  { %v1061_v30 = vpop.permute.xlu0 %1060 }
 0x27e   :  { %v1092_v24 = vsel %vm1090_vm9, %v1061_v30, %v1077_v54  ;;  %v1100_v3 = vsel %vm1090_vm9, %v1077_v54, %v1061_v30 }
 0x27f   :  { %v1114_v10 = vsel %vm226_vm10, %v1100_v3, 0.0  ;;  %v1129_v36 = vadd.f32 %v1092_v24, %v1044_v4 }
 0x280   :  { %v1130_v9 = vadd.f32 %v1114_v10, %v1045_v1 }
 0x281   :  { %v1145_v43 = vmax.f32 %v1129_v36, 0.0 }
 0x282   :  { %v1146_v5 = vmax.f32 %v1130_v9, 0.0 }
 0x283   :  { %1184 = vmatpush.msrb.mxu2 %v1145_v43 }
 0x284   :  { %1204 = vmatpush.msrb.mxu3 %v1146_v5 }
 0x285   :  { %v1075_v42 = vpop.permute.xlu0 %1074 }
 0x286   :  { %v1091_v59 = vsel %vm1090_vm9, %v1059_v13, %v1075_v42  ;;  %v1099_v57 = vsel %vm1090_vm9, %v1075_v42, %v1059_v13 }
 0x287   :  { %v1112_v39 = vsel %vm226_vm10, %v1099_v57, 0.0  ;;  %v1127_v7 = vadd.f32 %v1091_v59, %v1042_v37 }
 0x288   :  { %v1128_v2 = vadd.f32 %v1112_v39, %v1043_v52 }
 0x289   :  { %v1143_v21 = vmax.f32 %v1127_v7, 0.0 }
 0x28a   :  { %v1144_v50 = vmax.f32 %v1128_v2, 0.0 }
 0x28b   :  { %1185 = vmatpush.msrb.mxu2 %v1143_v21 }
 0x28c   :  { %1244 = vmatmul.msk.f32.vlgmr.msrb.gmra.mxu2 %vm1166_vm11, %v1159_v49  ;;  %1205 = vmatpush.msrb.mxu3 %v1144_v50 }
 0x28d   :  { %1245 = vmatmul.msk.f32.vlgmr.msrb.gmra.mxu3 %vm1166_vm11, %v1159_v49 }
 0x30f   :  { %v1187_v40 = vpop.f32.mrf.mxu2 }
 0x310   :  { %v1188_v32 = vadd.f32 %v1187_v40, %v1164_v48  ;;  %v1207_v58 = vpop.f32.mrf.mxu3 }
 0x311   :  { %v1208_v34 = vadd.f32 %v1207_v58, %v1164_v48 }
 0x312   :  { %1210 = vst [vmem:[#allocation2] sm:$0xff] %v1188_v32 }
 0x313   :  { %1211 = vst [vmem:[#allocation2 + $0x8] sm:$0xff] %v1208_v34 }
 0x314   :  { %1222 = dma.vmem_to_hbm [thread:$0]  %s1218_s1, 256, %s1220_s25, [#allocation3]  }
 0x315   :  { %1320 = dma.done.wait [#allocation3], 256  }
 0x316   :  { %1321 = vsyncadd [#allocation3], 4294967040 }
 0x317   :  { %1227 = vsyncpa [#allocation3], 1 }

</bundles_post_ra>
